<compile_context>
chip_gen: v6e
topology: v6e:2x2x1
jax: 0.10.0
libtpu: 0.0.40
codegen_flags: <defaults>
</compile_context>

<pallas_src>
import functools

import jax
import jax.numpy as jnp
from jax import lax
from jax.experimental import pallas as pl
from jax.experimental.pallas import tpu as pltpu

BN_EPS = 1e-5


def _conv_block_kernel(x_ref, w1_ref, w2_ref, g1_ref, be1_ref, g2_ref, be2_ref,
                       m1_ref, m2_ref, sel_ref, o_ref,
                       *, r, img_w, kh, kw, cout, cnt1, cnt2):
    """Whole ConvBlock on VMEM-resident (C, R) data, R = N*H*W on the lane axis.

    A stride-1 'valid' conv anchored at the top-left of the full HxW grid is
        acc[co, f] = sum_{dy,dx,ci} w[co, ci, dy, dx] * src[ci, f + dy*W + dx]
    evaluated as ONE MXU matmul of the (Cout, 9*Csrc) tap-major weights against the
    sublane-stacked 9 lane-rotations of src.  Rotation wrap-around only reaches positions
    outside the valid output window; those are masked out of the BN statistics and never
    selected by the pool gather.
    """

    def shift(v, d):
        # result[:, i] = v[:, (i + d) % r]   == jnp.roll(v, -d, axis=1); shift kept >= 0.
        return v if d == 0 else pltpu.roll(v, r - d, axis=1)

    def conv_bn_relu(src, w2d, gamma, beta, mask_col, inv_cnt):
        # conv: stack rolled taps along sublanes, single MXU matmul (K = kh*kw*Csrc)
        stacked = jnp.concatenate(
            [shift(src, dy * img_w + dx) for dy in range(kh) for dx in range(kw)],
            axis=0)                                                       # (kh*kw*Csrc, R)
        acc = jnp.dot(w2d, stacked, preferred_element_type=jnp.float32)   # (Cout, R)
        # training-mode BatchNorm (batch stats, biased var) + ReLU.
        # Masked sum and sum-of-squares in one MXU matvec; the conv bias is omitted because a
        # bias added right before the mean subtraction cancels exactly.
        stats = jnp.dot(jnp.concatenate([acc, acc * acc], axis=0), mask_col,
                        preferred_element_type=jnp.float32)               # (2*Cout, 1)
        mean = stats[:cout, :] * inv_cnt
        var = jnp.maximum(stats[cout:, :] * inv_cnt - mean * mean, 0.0)
        scale = gamma * lax.rsqrt(var + BN_EPS)
        return jnp.maximum((acc - mean) * scale + beta, 0.0)              # (Cout, R)

    h1 = conv_bn_relu(x_ref[...], w1_ref[...], g1_ref[...], be1_ref[...],
                      m1_ref[...], 1.0 / cnt1)
    h2 = conv_bn_relu(h1, w2_ref[...], g2_ref[...], be2_ref[...],
                      m2_ref[...], 1.0 / cnt2)

    # 2x2 max pool: 4-way max via XLU lane rotations, then one MXU gather matmul compacting
    # the valid window anchors into the dense (Cout, N*hp*wp) output slab.
    pm = jnp.maximum(jnp.maximum(h2, shift(h2, 1)),
                     jnp.maximum(shift(h2, img_w), shift(h2, img_w + 1)))
    o_ref[...] = jnp.dot(pm, sel_ref[...], preferred_element_type=jnp.float32)


@jax.jit
def conv_block_forward(x_nchw, params):
    n, cin, h, w = x_nchw.shape
    cout, _, kh, kw = params["w1"].shape
    ho1, wo1 = h - (kh - 1), w - (kw - 1)          # 14, 14
    ho2, wo2 = ho1 - (kh - 1), wo1 - (kw - 1)      # 12, 12
    hp, wp = ho2 // 2, wo2 // 2                    # 6, 6
    hw = h * w
    r = n * hw
    npool = hp * wp

    # The lane-rotation trick assumes stride-1 VALID convs over one flat HxW grid, and the
    # aligned sublane stacking assumes cout is a multiple of the f32 sublane tile.
    assert ho2 > 0 and wo2 > 0 and ho2 % 2 == 0 and wo2 % 2 == 0
    assert cout % 8 == 0

    # ---- layout plumbing & shape-only constants, hoisted out of the kernel ---------------
    cin_p = ((cin + 7) // 8) * 8                   # pad input channels to the sublane tile
    x2d = jnp.transpose(x_nchw.astype(jnp.float32), (1, 0, 2, 3)).reshape(cin, r)
    x2d = jnp.pad(x2d, ((0, cin_p - cin), (0, 0)))                      # (Cin_p, R)
    # tap-major 2-D weights: w1t[co, (dy*kw+dx)*cin_p + ci] = w1[co, ci, dy, dx]
    w1_p = jnp.pad(params["w1"].astype(jnp.float32),
                   ((0, 0), (0, cin_p - cin), (0, 0), (0, 0)))
    w1t = jnp.transpose(w1_p, (0, 2, 3, 1)).reshape(cout, kh * kw * cin_p)
    w2t = jnp.transpose(params["w2"].astype(jnp.float32),
                        (0, 2, 3, 1)).reshape(cout, kh * kw * cout)
    g1 = params["g1"].astype(jnp.float32).reshape(cout, 1)
    be1 = params["beta1"].astype(jnp.float32).reshape(cout, 1)
    g2 = params["g2"].astype(jnp.float32).reshape(cout, 1)
    be2 = params["beta2"].astype(jnp.float32).reshape(cout, 1)
    # NOTE: conv biases b1/b2 are intentionally not passed: a bias added immediately before a
    # training-mode BatchNorm is cancelled exactly by the mean subtraction.

    # BN validity masks over flat positions f = i*H*W + y*W + x (constant-folded by XLA).
    f = jnp.arange(r, dtype=jnp.int32)
    fx, fy, fi = f % w, (f // w) % h, f // hw
    m1 = ((fx < wo1) & (fy < ho1)).astype(jnp.float32).reshape(r, 1)
    m2 = ((fx < wo2) & (fy < ho2)).astype(jnp.float32).reshape(r, 1)
    # One-hot pool-gather matrix: sel[f, i*npool + (y//2)*wp + (x//2)] = 1 at 2x2 anchors.
    anchor = (fx < wo2) & (fy < ho2) & (fx % 2 == 0) & (fy % 2 == 0)
    q = fi * npool + (fy // 2) * wp + (fx // 2)
    sel = (anchor[:, None]
           & (q[:, None] == jnp.arange(n * npool, dtype=jnp.int32)[None, :])
           ).astype(jnp.float32)                                        # (R, N*npool)

    kernel = functools.partial(_conv_block_kernel, r=r, img_w=w, kh=kh, kw=kw, cout=cout,
                               cnt1=float(n * ho1 * wo1), cnt2=float(n * ho2 * wo2))
    vmem = pl.BlockSpec(memory_space=pltpu.MemorySpace.VMEM)
    pooled = pl.pallas_call(
        kernel,
        out_shape=jax.ShapeDtypeStruct((cout, n * npool), jnp.float32),
        in_specs=[vmem] * 10,
        out_specs=vmem,
    )(x2d, w1t, w2t, g1, be1, g2, be2, m1, m2, sel)
    # (Cout, N*npool) -> NCHW, pure wrapper-side layout plumbing
    return jnp.transpose(pooled.reshape(cout, n, hp, wp), (1, 0, 2, 3))


# ----------------------------------------------------------------------------
# Pure-JAX reference (mirrors the PyTorch forward) used only for self-validation.
# ----------------------------------------------------------------------------
def reference_forward(x, params):
    def conv(inp, wgt, b):
        y = lax.conv_general_dilated(inp, wgt, window_strides=(1, 1), padding="VALID",
                                     dimension_numbers=("NCHW", "OIHW", "NCHW"),
                                     precision=lax.Precision.HIGHEST)
        return y + b[None, :, None, None]

    def bn(y, g, beta):
        m = jnp.mean(y, axis=(0, 2, 3), keepdims=True)
        v = jnp.mean(jnp.square(y - m), axis=(0, 2, 3), keepdims=True)
        return (y - m) * lax.rsqrt(v + BN_EPS) * g[None, :, None, None] + beta[None, :, None, None]

    y = jnp.maximum(bn(conv(x, params["w1"], params["b1"]), params["g1"], params["beta1"]), 0.0)
    y = jnp.maximum(bn(conv(y, params["w2"], params["b2"]), params["g2"], params["beta2"]), 0.0)
    n, c, hh, ww = y.shape
    return y.reshape(n, c, hh // 2, 2, ww // 2, 2).max(axis=(3, 5))


def init_params(key, channel_in, channel_out, kernel_size):
    ks = jax.random.split(key, 8)
    fan1 = channel_in * kernel_size * kernel_size
    fan2 = channel_out * kernel_size * kernel_size
    bnd1 = 1.0 / jnp.sqrt(fan1)
    bnd2 = 1.0 / jnp.sqrt(fan2)
    return {
        "w1": jax.random.uniform(ks[0], (channel_out, channel_in, kernel_size, kernel_size),
                                 jnp.float32, -bnd1, bnd1),
        "b1": jax.random.uniform(ks[1], (channel_out,), jnp.float32, -bnd1, bnd1),
        "g1": 1.0 + 0.1 * jax.random.normal(ks[2], (channel_out,), jnp.float32),
        "beta1": 0.1 * jax.random.normal(ks[3], (channel_out,), jnp.float32),
        "w2": jax.random.uniform(ks[4], (channel_out, channel_out, kernel_size, kernel_size),
                                 jnp.float32, -bnd2, bnd2),
        "b2": jax.random.uniform(ks[5], (channel_out,), jnp.float32, -bnd2, bnd2),
        "g2": 1.0 + 0.1 * jax.random.normal(ks[6], (channel_out,), jnp.float32),
        "beta2": 0.1 * jax.random.normal(ks[7], (channel_out,), jnp.float32),
    }


if __name__ == "__main__":
    key = jax.random.PRNGKey(0)
    k_x, k_p = jax.random.split(key)

    N, C_IN, C_OUT, H, W, KS = 2, 4, 8, 16, 16, 3
    x = jax.random.normal(k_x, (N, C_IN, H, W), jnp.float32)   # NCHW, like PyTorch
    params = init_params(k_p, C_IN, C_OUT, KS)

    out = jax.block_until_ready(conv_block_forward(x, params))

    # 16 -> conv3x3 -> 14 -> conv3x3 -> 12 -> maxpool2 -> 6
    assert out.shape == (N, C_OUT, 6, 6), out.shape
    assert bool(jnp.all(jnp.isfinite(out)))

    ref = jax.block_until_ready(reference_forward(x, params))
    max_err = float(jnp.max(jnp.abs(out - ref)))
    assert max_err < 2e-3, f"mismatch vs reference: max abs err = {max_err}"

    print("KERNEL_OK")
</pallas_src>

<mosaic_0001>
module attributes {stable_mosaic.version = 11 : i64} {
  func.func @_conv_block_kernel(%arg0: memref<8x512xf32, #tpu.memory_space<vmem>>, %arg1: memref<8x72xf32, #tpu.memory_space<vmem>>, %arg2: memref<8x72xf32, #tpu.memory_space<vmem>>, %arg3: memref<8x1xf32, #tpu.memory_space<vmem>>, %arg4: memref<8x1xf32, #tpu.memory_space<vmem>>, %arg5: memref<8x1xf32, #tpu.memory_space<vmem>>, %arg6: memref<8x1xf32, #tpu.memory_space<vmem>>, %arg7: memref<512x1xf32, #tpu.memory_space<vmem>>, %arg8: memref<512x1xf32, #tpu.memory_space<vmem>>, %arg9: memref<512x72xf32, #tpu.memory_space<vmem>>, %arg10: memref<8x72xf32, #tpu.memory_space<vmem>>) attributes {dimension_semantics = [], scalar_prefetch = 0 : i64, scratch_operands = 0 : i64, tpu.core_type = #tpu.core_type<tc>} {
    %c0 = arith.constant 0 : index
    %c0_0 = arith.constant 0 : index
    %0 = vector.load %arg0[%c0, %c0_0] : memref<8x512xf32, #tpu.memory_space<vmem>>, vector<8x512xf32>
    %c0_1 = arith.constant 0 : index
    %c0_2 = arith.constant 0 : index
    %1 = vector.load %arg1[%c0_1, %c0_2] : memref<8x72xf32, #tpu.memory_space<vmem>>, vector<8x72xf32>
    %c0_3 = arith.constant 0 : index
    %c0_4 = arith.constant 0 : index
    %2 = vector.load %arg3[%c0_3, %c0_4] : memref<8x1xf32, #tpu.memory_space<vmem>>, vector<8x1xf32>
    %c0_5 = arith.constant 0 : index
    %c0_6 = arith.constant 0 : index
    %3 = vector.load %arg4[%c0_5, %c0_6] : memref<8x1xf32, #tpu.memory_space<vmem>>, vector<8x1xf32>
    %c0_7 = arith.constant 0 : index
    %c0_8 = arith.constant 0 : index
    %4 = vector.load %arg7[%c0_7, %c0_8] : memref<512x1xf32, #tpu.memory_space<vmem>>, vector<512x1xf32>
    %c511_i32 = arith.constant 511 : i32
    %5 = tpu.dynamic_rotate %0 by %c511_i32 dim 1 : vector<8x512xf32>, i32 -> vector<8x512xf32>
    %c510_i32 = arith.constant 510 : i32
    %6 = tpu.dynamic_rotate %0 by %c510_i32 dim 1 : vector<8x512xf32>, i32 -> vector<8x512xf32>
    %c496_i32 = arith.constant 496 : i32
    %7 = tpu.dynamic_rotate %0 by %c496_i32 dim 1 : vector<8x512xf32>, i32 -> vector<8x512xf32>
    %c495_i32 = arith.constant 495 : i32
    %8 = tpu.dynamic_rotate %0 by %c495_i32 dim 1 : vector<8x512xf32>, i32 -> vector<8x512xf32>
    %c494_i32 = arith.constant 494 : i32
    %9 = tpu.dynamic_rotate %0 by %c494_i32 dim 1 : vector<8x512xf32>, i32 -> vector<8x512xf32>
    %c480_i32 = arith.constant 480 : i32
    %10 = tpu.dynamic_rotate %0 by %c480_i32 dim 1 : vector<8x512xf32>, i32 -> vector<8x512xf32>
    %c479_i32 = arith.constant 479 : i32
    %11 = tpu.dynamic_rotate %0 by %c479_i32 dim 1 : vector<8x512xf32>, i32 -> vector<8x512xf32>
    %c478_i32 = arith.constant 478 : i32
    %12 = tpu.dynamic_rotate %0 by %c478_i32 dim 1 : vector<8x512xf32>, i32 -> vector<8x512xf32>
    %13 = tpu.concatenate %0, %5, %6, %7, %8, %9, %10, %11, %12 in 0 : vector<8x512xf32>, vector<8x512xf32>, vector<8x512xf32>, vector<8x512xf32>, vector<8x512xf32>, vector<8x512xf32>, vector<8x512xf32>, vector<8x512xf32>, vector<8x512xf32> -> vector<72x512xf32>
    %cst = arith.constant dense<0.000000e+00> : vector<8x512xf32>
    %14 = tpu.matmul %1, %13, %cst {dimension_numbers = #tpu.dot_dimension_numbers<[1], [0], [0], [1], [0, 0, 1, 1], [], []>} : vector<8x72xf32>, vector<72x512xf32>, vector<8x512xf32> -> vector<8x512xf32>
    %15 = arith.mulf %14, %14 : vector<8x512xf32>
    %16 = tpu.concatenate %14, %15 in 0 : vector<8x512xf32>, vector<8x512xf32> -> vector<16x512xf32>
    %cst_9 = arith.constant dense<0.000000e+00> : vector<16x1xf32>
    %17 = tpu.matmul %16, %4, %cst_9 {dimension_numbers = #tpu.dot_dimension_numbers<[1], [0], [0], [1], [0, 0, 1, 1], [], []>} : vector<16x512xf32>, vector<512x1xf32>, vector<16x1xf32> -> vector<16x1xf32>
    %18 = vector.extract_strided_slice %17 {offsets = [0, 0], sizes = [8, 1], strides = [1, 1]} : vector<16x1xf32> to vector<8x1xf32>
    %cst_10 = arith.constant 0.00255102036 : f32
    %19 = vector.broadcast %cst_10 : f32 to vector<8x1xf32>
    %20 = arith.mulf %18, %19 : vector<8x1xf32>
    %21 = vector.extract_strided_slice %17 {offsets = [8, 0], sizes = [8, 1], strides = [1, 1]} : vector<16x1xf32> to vector<8x1xf32>
    %cst_11 = arith.constant 0.00255102036 : f32
    %22 = vector.broadcast %cst_11 : f32 to vector<8x1xf32>
    %23 = arith.mulf %21, %22 : vector<8x1xf32>
    %24 = arith.mulf %20, %20 : vector<8x1xf32>
    %25 = arith.subf %23, %24 : vector<8x1xf32>
    %cst_12 = arith.constant 0.000000e+00 : f32
    %26 = vector.broadcast %cst_12 : f32 to vector<8x1xf32>
    %27 = arith.maximumf %25, %26 : vector<8x1xf32>
    %cst_13 = arith.constant 9.99999974E-6 : f32
    %28 = vector.broadcast %cst_13 : f32 to vector<8x1xf32>
    %29 = arith.addf %27, %28 : vector<8x1xf32>
    %30 = math.rsqrt %29 : vector<8x1xf32>
    %31 = arith.mulf %2, %30 : vector<8x1xf32>
    %32 = vector.broadcast %20 : vector<8x1xf32> to vector<8x512xf32>
    %33 = arith.subf %14, %32 : vector<8x512xf32>
    %34 = vector.broadcast %31 : vector<8x1xf32> to vector<8x512xf32>
    %35 = arith.mulf %33, %34 : vector<8x512xf32>
    %36 = vector.broadcast %3 : vector<8x1xf32> to vector<8x512xf32>
    %37 = arith.addf %35, %36 : vector<8x512xf32>
    %cst_14 = arith.constant 0.000000e+00 : f32
    %38 = vector.broadcast %cst_14 : f32 to vector<8x512xf32>
    %39 = arith.maximumf %37, %38 : vector<8x512xf32>
    %c0_15 = arith.constant 0 : index
    %c0_16 = arith.constant 0 : index
    %40 = vector.load %arg2[%c0_15, %c0_16] : memref<8x72xf32, #tpu.memory_space<vmem>>, vector<8x72xf32>
    %c0_17 = arith.constant 0 : index
    %c0_18 = arith.constant 0 : index
    %41 = vector.load %arg5[%c0_17, %c0_18] : memref<8x1xf32, #tpu.memory_space<vmem>>, vector<8x1xf32>
    %c0_19 = arith.constant 0 : index
    %c0_20 = arith.constant 0 : index
    %42 = vector.load %arg6[%c0_19, %c0_20] : memref<8x1xf32, #tpu.memory_space<vmem>>, vector<8x1xf32>
    %c0_21 = arith.constant 0 : index
    %c0_22 = arith.constant 0 : index
    %43 = vector.load %arg8[%c0_21, %c0_22] : memref<512x1xf32, #tpu.memory_space<vmem>>, vector<512x1xf32>
    %c511_i32_23 = arith.constant 511 : i32
    %44 = tpu.dynamic_rotate %39 by %c511_i32_23 dim 1 : vector<8x512xf32>, i32 -> vector<8x512xf32>
    %c510_i32_24 = arith.constant 510 : i32
    %45 = tpu.dynamic_rotate %39 by %c510_i32_24 dim 1 : vector<8x512xf32>, i32 -> vector<8x512xf32>
    %c496_i32_25 = arith.constant 496 : i32
    %46 = tpu.dynamic_rotate %39 by %c496_i32_25 dim 1 : vector<8x512xf32>, i32 -> vector<8x512xf32>
    %c495_i32_26 = arith.constant 495 : i32
    %47 = tpu.dynamic_rotate %39 by %c495_i32_26 dim 1 : vector<8x512xf32>, i32 -> vector<8x512xf32>
    %c494_i32_27 = arith.constant 494 : i32
    %48 = tpu.dynamic_rotate %39 by %c494_i32_27 dim 1 : vector<8x512xf32>, i32 -> vector<8x512xf32>
    %c480_i32_28 = arith.constant 480 : i32
    %49 = tpu.dynamic_rotate %39 by %c480_i32_28 dim 1 : vector<8x512xf32>, i32 -> vector<8x512xf32>
    %c479_i32_29 = arith.constant 479 : i32
    %50 = tpu.dynamic_rotate %39 by %c479_i32_29 dim 1 : vector<8x512xf32>, i32 -> vector<8x512xf32>
    %c478_i32_30 = arith.constant 478 : i32
    %51 = tpu.dynamic_rotate %39 by %c478_i32_30 dim 1 : vector<8x512xf32>, i32 -> vector<8x512xf32>
    %52 = tpu.concatenate %39, %44, %45, %46, %47, %48, %49, %50, %51 in 0 : vector<8x512xf32>, vector<8x512xf32>, vector<8x512xf32>, vector<8x512xf32>, vector<8x512xf32>, vector<8x512xf32>, vector<8x512xf32>, vector<8x512xf32>, vector<8x512xf32> -> vector<72x512xf32>
    %cst_31 = arith.constant dense<0.000000e+00> : vector<8x512xf32>
    %53 = tpu.matmul %40, %52, %cst_31 {dimension_numbers = #tpu.dot_dimension_numbers<[1], [0], [0], [1], [0, 0, 1, 1], [], []>} : vector<8x72xf32>, vector<72x512xf32>, vector<8x512xf32> -> vector<8x512xf32>
    %54 = arith.mulf %53, %53 : vector<8x512xf32>
    %55 = tpu.concatenate %53, %54 in 0 : vector<8x512xf32>, vector<8x512xf32> -> vector<16x512xf32>
    %cst_32 = arith.constant dense<0.000000e+00> : vector<16x1xf32>
    %56 = tpu.matmul %55, %43, %cst_32 {dimension_numbers = #tpu.dot_dimension_numbers<[1], [0], [0], [1], [0, 0, 1, 1], [], []>} : vector<16x512xf32>, vector<512x1xf32>, vector<16x1xf32> -> vector<16x1xf32>
    %57 = vector.extract_strided_slice %56 {offsets = [0, 0], sizes = [8, 1], strides = [1, 1]} : vector<16x1xf32> to vector<8x1xf32>
    %cst_33 = arith.constant 0.00347222225 : f32
    %58 = vector.broadcast %cst_33 : f32 to vector<8x1xf32>
    %59 = arith.mulf %57, %58 : vector<8x1xf32>
    %60 = vector.extract_strided_slice %56 {offsets = [8, 0], sizes = [8, 1], strides = [1, 1]} : vector<16x1xf32> to vector<8x1xf32>
    %cst_34 = arith.constant 0.00347222225 : f32
    %61 = vector.broadcast %cst_34 : f32 to vector<8x1xf32>
    %62 = arith.mulf %60, %61 : vector<8x1xf32>
    %63 = arith.mulf %59, %59 : vector<8x1xf32>
    %64 = arith.subf %62, %63 : vector<8x1xf32>
    %cst_35 = arith.constant 0.000000e+00 : f32
    %65 = vector.broadcast %cst_35 : f32 to vector<8x1xf32>
    %66 = arith.maximumf %64, %65 : vector<8x1xf32>
    %cst_36 = arith.constant 9.99999974E-6 : f32
    %67 = vector.broadcast %cst_36 : f32 to vector<8x1xf32>
    %68 = arith.addf %66, %67 : vector<8x1xf32>
    %69 = math.rsqrt %68 : vector<8x1xf32>
    %70 = arith.mulf %41, %69 : vector<8x1xf32>
    %71 = vector.broadcast %59 : vector<8x1xf32> to vector<8x512xf32>
    %72 = arith.subf %53, %71 : vector<8x512xf32>
    %73 = vector.broadcast %70 : vector<8x1xf32> to vector<8x512xf32>
    %74 = arith.mulf %72, %73 : vector<8x512xf32>
    %75 = vector.broadcast %42 : vector<8x1xf32> to vector<8x512xf32>
    %76 = arith.addf %74, %75 : vector<8x512xf32>
    %cst_37 = arith.constant 0.000000e+00 : f32
    %77 = vector.broadcast %cst_37 : f32 to vector<8x512xf32>
    %78 = arith.maximumf %76, %77 : vector<8x512xf32>
    %c511_i32_38 = arith.constant 511 : i32
    %79 = tpu.dynamic_rotate %78 by %c511_i32_38 dim 1 : vector<8x512xf32>, i32 -> vector<8x512xf32>
    %80 = arith.maximumf %78, %79 : vector<8x512xf32>
    %c496_i32_39 = arith.constant 496 : i32
    %81 = tpu.dynamic_rotate %78 by %c496_i32_39 dim 1 : vector<8x512xf32>, i32 -> vector<8x512xf32>
    %c495_i32_40 = arith.constant 495 : i32
    %82 = tpu.dynamic_rotate %78 by %c495_i32_40 dim 1 : vector<8x512xf32>, i32 -> vector<8x512xf32>
    %83 = arith.maximumf %81, %82 : vector<8x512xf32>
    %84 = arith.maximumf %80, %83 : vector<8x512xf32>
    %c0_41 = arith.constant 0 : index
    %c0_42 = arith.constant 0 : index
    %85 = vector.load %arg9[%c0_41, %c0_42] : memref<512x72xf32, #tpu.memory_space<vmem>>, vector<512x72xf32>
    %cst_43 = arith.constant dense<0.000000e+00> : vector<8x72xf32>
    %86 = tpu.matmul %84, %85, %cst_43 {dimension_numbers = #tpu.dot_dimension_numbers<[1], [0], [0], [1], [0, 0, 1, 1], [], []>} : vector<8x512xf32>, vector<512x72xf32>, vector<8x72xf32> -> vector<8x72xf32>
    %c0_44 = arith.constant 0 : index
    %c0_45 = arith.constant 0 : index
    %87 = vector.load %arg10[%c0_44, %c0_45] : memref<8x72xf32, #tpu.memory_space<vmem>>, vector<8x72xf32>
    tpu.vector_store %arg10[%c0_44, %c0_45], %86 {strides = array<i32>} : memref<8x72xf32, #tpu.memory_space<vmem>>, vector<8x72xf32>,
    return
  }
}

</mosaic_0001>

<bundles_post_ra>
// kernel: conv_block_forward.1
= control target key start
LH: loop header
LB: loop body
LE: loop exit
PB: predicated region body
PF: predicated region fallthrough
CT: control target
= control target key end

     0   :  { %s1581_s17 = smov 94   ;;  %s1582_s22 = smov 95   ;;  %v1588_v4 = vmov 0.0   ;;  %v114_v5 = vlaneseq  ;;  %vm212_vm8 = vcmask 588800   ;;  %s2624_s0 = inlined_call_operand.vmem [shape: f32[8,512], index: 0, kind: input, shape index: {}]   ;;  %s2625_s1 = inlined_call_operand.vmem [shape: f32[8,72], index: 1, kind: input, shape index: {}]   ;;  %s2626_s7 = inlined_call_operand.vmem [shape: f32[512,1], index: 7, kind: input, shape index: {}]   ;;  %s2627_s3 = inlined_call_operand.vmem [shape: f32[8,1], index: 3, kind: input, shape index: {}]   ;;  %s2628_s4 = inlined_call_operand.vmem [shape: f32[8,1], index: 4, kind: input, shape index: {}]   ;;  %s2629_s2 = inlined_call_operand.vmem [shape: f32[8,72], index: 2, kind: input, shape index: {}]   ;;  %s2630_s8 = inlined_call_operand.vmem [shape: f32[512,1], index: 8, kind: input, shape index: {}]   ;;  %s2631_s6 = inlined_call_operand.vmem [shape: f32[8,1], index: 6, kind: input, shape index: {}]   ;;  %s2632_s5 = inlined_call_operand.vmem [shape: f32[8,1], index: 5, kind: input, shape index: {}]   ;;  %s2633_s9 = inlined_call_operand.vmem [shape: f32[512,72], index: 9, kind: input, shape index: {}]   ;;  %s2634_s10 = inlined_call_operand.vmem [shape: f32[8,72], index: 10, kind: output, shape index: {}]  }
   0x1   :  { %v1649_v0 = vld [vmem:[%s2624_s0 + $0x10] sm:$0xff]  ;;  %v1654_v1 = vld [vmem:[%s2624_s0] sm:$0xff]  ;;  %v1663_v2 = vld [vmem:[%s2624_s0 + $0x18] sm:$0xff]  ;;  %s1584_s23 = smov 110   ;;  %s1585_s24 = smov 111   ;;  %280 = vmatprep.mubr.f32.mxu0 %v1588_v4  ;;  %351 = vmatprep.mubr.f32.mxu1 %v1588_v4 }
   0x2   :  { %203 = vrot.lane.b32.xlu1 %v1649_v0, %s1581_s17  ;;  %199 = vrot.lane.b32.xlu0 %v1654_v1, %s1581_s17  ;;  %v1668_v3 = vld [vmem:[%s2624_s0 + $0x8] sm:$0xff]  ;;  %s1583_s0 = smov 96   ;;  %s1586_s25 = smov 112   ;;  %v1732_v6 = vand.u32 127, %v114_v5 }
   0x3   :  { %s1587_s26 = smov 126   ;;  %s1589_s27 = smov 127  }
   0x4   :  { %vm207_vm0 = vcmp.lt.s32.totalorder %v1732_v6, 94  ;;  %vm194_vm1 = vcmp.lt.s32.totalorder %v1732_v6, 95  ;;  %vm181_vm2 = vcmp.lt.s32.totalorder %v1732_v6, 96  ;;  %vm168_vm3 = vcmp.lt.s32.totalorder %v1732_v6, 110 }
   0x5   :  { %vm155_vm4 = vcmp.lt.s32.totalorder %v1732_v6, 111  ;;  %vm142_vm5 = vcmp.lt.s32.totalorder %v1732_v6, 112  ;;  %vm129_vm6 = vcmp.lt.s32.totalorder %v1732_v6, 126  ;;  %vm116_vm7 = vcmp.lt.s32.totalorder %v1732_v6, 127 }
   0x6   :  { %205 = vrot.lane.b32.xlu1 %v1663_v2, %s1581_s17  ;;  %201 = vrot.lane.b32.xlu0 %v1668_v3, %s1581_s17 }
   0xa   :  { %188 = vrot.lane.b32.xlu1 %v1668_v3, %s1582_s22  ;;  %186 = vrot.lane.b32.xlu0 %v1654_v1, %s1582_s22 }
   0xe   :  { %192 = vrot.lane.b32.xlu1 %v1663_v2, %s1582_s22  ;;  %190 = vrot.lane.b32.xlu0 %v1649_v0, %s1582_s22 }
  0x12   :  { %175 = vrot.lane.b32.xlu1 %v1668_v3, %s1583_s0  ;;  %173 = vrot.lane.b32.xlu0 %v1654_v1, %s1583_s0 }
  0x16   :  { %179 = vrot.lane.b32.xlu1 %v1663_v2, %s1583_s0  ;;  %177 = vrot.lane.b32.xlu0 %v1649_v0, %s1583_s0 }
  0x1a   :  { %162 = vrot.lane.b32.xlu1 %v1668_v3, %s1584_s23  ;;  %160 = vrot.lane.b32.xlu0 %v1654_v1, %s1584_s23 }
  0x1e   :  { %166 = vrot.lane.b32.xlu1 %v1663_v2, %s1584_s23  ;;  %164 = vrot.lane.b32.xlu0 %v1649_v0, %s1584_s23 }
  0x22   :  { %149 = vrot.lane.b32.xlu1 %v1668_v3, %s1585_s24  ;;  %147 = vrot.lane.b32.xlu0 %v1654_v1, %s1585_s24 }
  0x26   :  { %153 = vrot.lane.b32.xlu1 %v1663_v2, %s1585_s24  ;;  %151 = vrot.lane.b32.xlu0 %v1649_v0, %s1585_s24 }
  0x2a   :  { %136 = vrot.lane.b32.xlu1 %v1668_v3, %s1586_s25  ;;  %134 = vrot.lane.b32.xlu0 %v1654_v1, %s1586_s25 }
  0x2e   :  { %140 = vrot.lane.b32.xlu1 %v1663_v2, %s1586_s25  ;;  %138 = vrot.lane.b32.xlu0 %v1649_v0, %s1586_s25 }
  0x32   :  { %123 = vrot.lane.b32.xlu1 %v1668_v3, %s1587_s26  ;;  %121 = vrot.lane.b32.xlu0 %v1654_v1, %s1587_s26 }
  0x36   :  { %127 = vrot.lane.b32.xlu1 %v1663_v2, %s1587_s26  ;;  %125 = vrot.lane.b32.xlu0 %v1649_v0, %s1587_s26 }
  0x3a   :  { %108 = vrot.lane.b32.xlu1 %v1668_v3, %s1589_s27  ;;  %106 = vrot.lane.b32.xlu0 %v1654_v1, %s1589_s27 }
  0x3e   :  { %112 = vrot.lane.b32.xlu1 %v1663_v2, %s1589_s27  ;;  %110 = vrot.lane.b32.xlu0 %v1649_v0, %s1589_s27 }
  0x74   :  { %v204_v7 = vpop.permute.xlu1 %203  ;;  %v200_v8 = vpop.permute.xlu0 %199 }
  0x78   :  { %v206_v9 = vpop.permute.xlu1 %205  ;;  %v202_v10 = vpop.permute.xlu0 %201 }
  0x79   :  { %v209_v11 = vsel %vm207_vm0, %v202_v10, %v204_v7  ;;  %v211_v12 = vsel %vm207_vm0, %v206_v9, %v200_v8  ;;  %v210_v13 = vsel %vm207_vm0, %v200_v8, %v202_v10  ;;  %v208_v14 = vsel %vm207_vm0, %v204_v7, %v206_v9 }
  0x7a   :  { %230 = vmatprep.subr.mxu0 %v209_v11  ;;  %301 = vmatprep.subr.mxu1 %v211_v12 }
  0x7b   :  { %231 = vmatpush1.msra.mxu0 %v210_v13  ;;  %302 = vmatpush1.msra.mxu1 %v208_v14  ;;  %v39_v13 = vld [vmem:[%s2625_s1] sm:$0xff]  ;;  %v73_v14 = vld [vmem:[%s2626_s7 + $0xf8] sm:$0xff] }
  0x7c   :  { %v189_v15 = vpop.permute.xlu1 %188  ;;  %v187_v16 = vpop.permute.xlu0 %186 }
  0x7d   :  { %v197_v22 = vsel %vm194_vm1, %v187_v16, %v189_v15 }
  0x80   :  { %v193_v17 = vpop.permute.xlu1 %192  ;;  %v191_v18 = vpop.permute.xlu0 %190 }
  0x81   :  { %v196_v19 = vsel %vm194_vm1, %v189_v15, %v191_v18  ;;  %v198_v20 = vsel %vm194_vm1, %v193_v17, %v187_v16  ;;  %v195_v21 = vsel %vm194_vm1, %v191_v18, %v193_v17  ;;  %v105_v15 = vld [vmem:[%s2626_s7 + $0x1f8] sm:$0xff]  ;;  %v88_v17 = vld [vmem:[%s2626_s7 + $0x170] sm:$0xff]  ;;  %v71_v18 = vld [vmem:[%s2626_s7 + $0xe8] sm:$0xff] }
  0x82   :  { %232 = vmatprep.subr.mxu0 %v196_v19  ;;  %303 = vmatprep.subr.mxu1 %v198_v20  ;;  %v57_v16 = vld [vmem:[%s2626_s7 + $0x78] sm:$0xff]  ;;  %v103_v19 = vld [vmem:[%s2626_s7 + $0x1e8] sm:$0xff] }
  0x83   :  { %233 = vmatpush1.msra.mxu0 %v197_v22  ;;  %304 = vmatpush1.msra.mxu1 %v195_v21  ;;  %v55_v20 = vld [vmem:[%s2626_s7 + $0x68] sm:$0xff]  ;;  %v70_v22 = vld [vmem:[%s2626_s7 + $0xe0] sm:$0xff] }
  0x84   :  { %v176_v23 = vpop.permute.xlu1 %175  ;;  %v174_v24 = vpop.permute.xlu0 %173  ;;  %v87_v21 = vld [vmem:[%s2626_s7 + $0x168] sm:$0xff] }
  0x85   :  { %v184_v30 = vsel %vm181_vm2, %v174_v24, %v176_v23 }
  0x88   :  { %v180_v25 = vpop.permute.xlu1 %179  ;;  %v178_v26 = vpop.permute.xlu0 %177 }
  0x89   :  { %v183_v27 = vsel %vm181_vm2, %v176_v23, %v178_v26  ;;  %v185_v28 = vsel %vm181_vm2, %v180_v25, %v174_v24  ;;  %v182_v29 = vsel %vm181_vm2, %v178_v26, %v180_v25  ;;  %v102_v23 = vld [vmem:[%s2626_s7 + $0x1e0] sm:$0xff]  ;;  %v69_v26 = vld [vmem:[%s2626_s7 + $0xd8] sm:$0xff] }
  0x8a   :  { %234 = vmatprep.subr.mxu0 %v183_v27  ;;  %305 = vmatprep.subr.mxu1 %v185_v28  ;;  %v54_v24 = vld [vmem:[%s2626_s7 + $0x60] sm:$0xff]  ;;  %v101_v27 = vld [vmem:[%s2626_s7 + $0x1d8] sm:$0xff] }
  0x8b   :  { %235 = vmatpush1.msra.mxu0 %v184_v30  ;;  %306 = vmatpush1.msra.mxu1 %v182_v29  ;;  %v86_v25 = vld [vmem:[%s2626_s7 + $0x160] sm:$0xff]  ;;  %v53_v28 = vld [vmem:[%s2626_s7 + $0x58] sm:$0xff]  ;;  %v68_v30 = vld [vmem:[%s2626_s7 + $0xd0] sm:$0xff] }
  0x8c   :  { %v163_v31 = vpop.permute.xlu1 %162  ;;  %v161_v32 = vpop.permute.xlu0 %160  ;;  %v85_v29 = vld [vmem:[%s2626_s7 + $0x158] sm:$0xff] }
  0x8d   :  { %v171_v38 = vsel %vm168_vm3, %v161_v32, %v163_v31 }
  0x90   :  { %v167_v33 = vpop.permute.xlu1 %166  ;;  %v165_v34 = vpop.permute.xlu0 %164 }
  0x91   :  { %v170_v35 = vsel %vm168_vm3, %v163_v31, %v165_v34  ;;  %v172_v36 = vsel %vm168_vm3, %v167_v33, %v161_v32  ;;  %v169_v37 = vsel %vm168_vm3, %v165_v34, %v167_v33  ;;  %v100_v31 = vld [vmem:[%s2626_s7 + $0x1d0] sm:$0xff]  ;;  %v67_v34 = vld [vmem:[%s2626_s7 + $0xc8] sm:$0xff] }
  0x92   :  { %236 = vmatprep.subr.mxu0 %v170_v35  ;;  %307 = vmatprep.subr.mxu1 %v172_v36  ;;  %v52_v32 = vld [vmem:[%s2626_s7 + $0x50] sm:$0xff]  ;;  %v99_v35 = vld [vmem:[%s2626_s7 + $0x1c8] sm:$0xff] }
  0x93   :  { %237 = vmatpush1.msra.mxu0 %v171_v38  ;;  %308 = vmatpush1.msra.mxu1 %v169_v37  ;;  %v84_v33 = vld [vmem:[%s2626_s7 + $0x150] sm:$0xff]  ;;  %v51_v36 = vld [vmem:[%s2626_s7 + $0x48] sm:$0xff]  ;;  %v66_v38 = vld [vmem:[%s2626_s7 + $0xc0] sm:$0xff] }
  0x94   :  { %v150_v39 = vpop.permute.xlu1 %149  ;;  %v148_v40 = vpop.permute.xlu0 %147  ;;  %v83_v37 = vld [vmem:[%s2626_s7 + $0x148] sm:$0xff] }
  0x95   :  { %v158_v46 = vsel %vm155_vm4, %v148_v40, %v150_v39 }
  0x98   :  { %v154_v41 = vpop.permute.xlu1 %153  ;;  %v152_v42 = vpop.permute.xlu0 %151 }
  0x99   :  { %v157_v43 = vsel %vm155_vm4, %v150_v39, %v152_v42  ;;  %v159_v44 = vsel %vm155_vm4, %v154_v41, %v148_v40  ;;  %v156_v45 = vsel %vm155_vm4, %v152_v42, %v154_v41  ;;  %v98_v39 = vld [vmem:[%s2626_s7 + $0x1c0] sm:$0xff]  ;;  %v65_v42 = vld [vmem:[%s2626_s7 + $0xb8] sm:$0xff] }
  0x9a   :  { %238 = vmatprep.subr.mxu0 %v157_v43  ;;  %309 = vmatprep.subr.mxu1 %v159_v44  ;;  %v50_v40 = vld [vmem:[%s2626_s7 + $0x40] sm:$0xff]  ;;  %v97_v43 = vld [vmem:[%s2626_s7 + $0x1b8] sm:$0xff] }
  0x9b   :  { %239 = vmatpush1.msra.mxu0 %v158_v46  ;;  %310 = vmatpush1.msra.mxu1 %v156_v45  ;;  %v82_v41 = vld [vmem:[%s2626_s7 + $0x140] sm:$0xff]  ;;  %v49_v44 = vld [vmem:[%s2626_s7 + $0x38] sm:$0xff]  ;;  %v64_v46 = vld [vmem:[%s2626_s7 + $0xb0] sm:$0xff] }
  0x9c   :  { %v137_v47 = vpop.permute.xlu1 %136  ;;  %v135_v48 = vpop.permute.xlu0 %134  ;;  %v81_v45 = vld [vmem:[%s2626_s7 + $0x138] sm:$0xff] }
  0x9d   :  { %v145_v54 = vsel %vm142_vm5, %v135_v48, %v137_v47 }
  0xa0   :  { %v141_v49 = vpop.permute.xlu1 %140  ;;  %v139_v50 = vpop.permute.xlu0 %138 }
  0xa1   :  { %v144_v51 = vsel %vm142_vm5, %v137_v47, %v139_v50  ;;  %v146_v52 = vsel %vm142_vm5, %v141_v49, %v135_v48  ;;  %v143_v53 = vsel %vm142_vm5, %v139_v50, %v141_v49  ;;  %v96_v47 = vld [vmem:[%s2626_s7 + $0x1b0] sm:$0xff]  ;;  %v63_v50 = vld [vmem:[%s2626_s7 + $0xa8] sm:$0xff] }
  0xa2   :  { %240 = vmatprep.subr.mxu0 %v144_v51  ;;  %311 = vmatprep.subr.mxu1 %v146_v52  ;;  %v48_v48 = vld [vmem:[%s2626_s7 + $0x30] sm:$0xff]  ;;  %v95_v51 = vld [vmem:[%s2626_s7 + $0x1a8] sm:$0xff] }
  0xa3   :  { %241 = vmatpush1.msra.mxu0 %v145_v54  ;;  %312 = vmatpush1.msra.mxu1 %v143_v53  ;;  %v80_v49 = vld [vmem:[%s2626_s7 + $0x130] sm:$0xff]  ;;  %v47_v52 = vld [vmem:[%s2626_s7 + $0x28] sm:$0xff]  ;;  %v62_v54 = vld [vmem:[%s2626_s7 + $0xa0] sm:$0xff] }
  0xa4   :  { %v124_v55 = vpop.permute.xlu1 %123  ;;  %v122_v56 = vpop.permute.xlu0 %121  ;;  %v79_v53 = vld [vmem:[%s2626_s7 + $0x128] sm:$0xff] }
  0xa5   :  { %v132_v62 = vsel %vm129_vm6, %v122_v56, %v124_v55 }
  0xa8   :  { %v128_v57 = vpop.permute.xlu1 %127  ;;  %v126_v58 = vpop.permute.xlu0 %125 }
  0xa9   :  { %v131_v59 = vsel %vm129_vm6, %v124_v55, %v126_v58  ;;  %v133_v60 = vsel %vm129_vm6, %v128_v57, %v122_v56  ;;  %v130_v61 = vsel %vm129_vm6, %v126_v58, %v128_v57  ;;  %v94_v55 = vld [vmem:[%s2626_s7 + $0x1a0] sm:$0xff]  ;;  %v61_v58 = vld [vmem:[%s2626_s7 + $0x98] sm:$0xff] }
  0xaa   :  { %242 = vmatprep.subr.mxu0 %v131_v59  ;;  %313 = vmatprep.subr.mxu1 %v133_v60  ;;  %v46_v56 = vld [vmem:[%s2626_s7 + $0x20] sm:$0xff]  ;;  %v93_v59 = vld [vmem:[%s2626_s7 + $0x198] sm:$0xff] }
  0xab   :  { %243 = vmatpush1.msra.mxu0 %v132_v62  ;;  %314 = vmatpush1.msra.mxu1 %v130_v61  ;;  %v78_v57 = vld [vmem:[%s2626_s7 + $0x120] sm:$0xff]  ;;  %v45_v60 = vld [vmem:[%s2626_s7 + $0x18] sm:$0xff]  ;;  %v60_v62 = vld [vmem:[%s2626_s7 + $0x90] sm:$0xff] }
  0xac   :  { %v109_v63 = vpop.permute.xlu1 %108  ;;  %v107_v5 = vpop.permute.xlu0 %106  ;;  %v77_v61 = vld [vmem:[%s2626_s7 + $0x118] sm:$0xff] }
  0xad   :  { %v119_v12 = vsel %vm116_vm7, %v107_v5, %v109_v63 }
  0xb0   :  { %v113_v7 = vpop.permute.xlu1 %112  ;;  %v111_v8 = vpop.permute.xlu0 %110 }
  0xb1   :  { %v118_v9 = vsel %vm116_vm7, %v109_v63, %v111_v8  ;;  %v120_v10 = vsel %vm116_vm7, %v113_v7, %v107_v5  ;;  %v117_v11 = vsel %vm116_vm7, %v111_v8, %v113_v7  ;;  %v92_v63 = vld [vmem:[%s2626_s7 + $0x190] sm:$0xff]  ;;  %v59_v8 = vld [vmem:[%s2626_s7 + $0x88] sm:$0xff] }
  0xb2   :  { %244 = vmatprep.subr.mxu0 %v118_v9  ;;  %315 = vmatprep.subr.mxu1 %v120_v10  ;;  %v44_v5 = vld [vmem:[%s2626_s7 + $0x10] sm:$0xff]  ;;  %v91_v9 = vld [vmem:[%s2626_s7 + $0x188] sm:$0xff] }
  0xb3   :  { %245 = vmatpush1.msra.mxu0 %v119_v12  ;;  %316 = vmatpush1.msra.mxu1 %v117_v11  ;;  %v76_v7 = vld [vmem:[%s2626_s7 + $0x110] sm:$0xff]  ;;  %v43_v10 = vld [vmem:[%s2626_s7 + $0x8] sm:$0xff]  ;;  %v58_v12 = vld [vmem:[%s2626_s7 + $0x80] sm:$0xff] }
  0xb4   :  { %246 = vmatprep.subr.mxu0 %v1668_v3  ;;  %317 = vmatprep.subr.mxu1 %v1663_v2  ;;  %v89_v2 = vld [vmem:[%s2626_s7 + $0x178] sm:$0xff]  ;;  %v72_v3 = vld [vmem:[%s2626_s7 + $0xf0] sm:$0xff]  ;;  %v75_v11 = vld [vmem:[%s2626_s7 + $0x108] sm:$0xff] }
  0xb5   :  { %247 = vmatpush1.msra.mxu0 %v1654_v1  ;;  %318 = vmatpush1.msra.mxu1 %v1649_v0  ;;  %v104_v0 = vld [vmem:[%s2626_s7 + $0x1f0] sm:$0xff] }
  0xb6   :  { %1309 = vmatmul.mubr.msk.f32.vlgmr.msra.gmra.mxu0 %vm212_vm8, %v39_v13  ;;  %1310 = vmatmul.mubr.msk.f32.vlgmr.msra.gmra.mxu1 %vm212_vm8, %v39_v13  ;;  %v56_v1 = vld [vmem:[%s2626_s7 + $0x70] sm:$0xff]  ;;  %v90_v13 = vld [vmem:[%s2626_s7 + $0x180] sm:$0xff] }
  0xb7   :  { %1313 = vmatprep.subr.mxu0 %v73_v14  ;;  %1351 = vmatprep.subr.mxu1 %v105_v15  ;;  %v42_v14 = vld [vmem:[%s2626_s7] sm:$0xff] }
  0xb8   :  { %1314 = vmatpush3.msra.mxu0 %v57_v16  ;;  %1352 = vmatpush3.msra.mxu1 %v89_v2  ;;  %v74_v15 = vld [vmem:[%s2626_s7 + $0x100] sm:$0xff] }
  0xb9   :  { %1315 = vmatprep.subr.mxu0 %v72_v3  ;;  %1353 = vmatprep.subr.mxu1 %v104_v0 }
  0xba   :  { %1316 = vmatpush3.msra.mxu0 %v56_v1  ;;  %1354 = vmatpush3.msra.mxu1 %v88_v17 }
  0xbb   :  { %1317 = vmatprep.subr.mxu0 %v71_v18  ;;  %1355 = vmatprep.subr.mxu1 %v103_v19 }
  0xbc   :  { %1318 = vmatpush3.msra.mxu0 %v55_v20  ;;  %1356 = vmatpush3.msra.mxu1 %v87_v21  ;;  %v1590_v20 = vmov 0  }
  0xbd   :  { %1319 = vmatprep.subr.mxu0 %v70_v22  ;;  %1357 = vmatprep.subr.mxu1 %v102_v23 }
  0xbe   :  { %1320 = vmatpush3.msra.mxu0 %v54_v24  ;;  %1358 = vmatpush3.msra.mxu1 %v86_v25 }
  0xbf   :  { %1321 = vmatprep.subr.mxu0 %v69_v26  ;;  %1359 = vmatprep.subr.mxu1 %v101_v27 }
  0xc0   :  { %1322 = vmatpush3.msra.mxu0 %v53_v28  ;;  %1360 = vmatpush3.msra.mxu1 %v85_v29 }
  0xc1   :  { %1323 = vmatprep.subr.mxu0 %v68_v30  ;;  %1361 = vmatprep.subr.mxu1 %v100_v31 }
  0xc2   :  { %1324 = vmatpush3.msra.mxu0 %v52_v32  ;;  %1362 = vmatpush3.msra.mxu1 %v84_v33 }
  0xc3   :  { %1325 = vmatprep.subr.mxu0 %v67_v34  ;;  %1363 = vmatprep.subr.mxu1 %v99_v35 }
  0xc4   :  { %1326 = vmatpush3.msra.mxu0 %v51_v36  ;;  %1364 = vmatpush3.msra.mxu1 %v83_v37 }
  0xc5   :  { %1327 = vmatprep.subr.mxu0 %v66_v38  ;;  %1365 = vmatprep.subr.mxu1 %v98_v39 }
  0xc6   :  { %1328 = vmatpush3.msra.mxu0 %v50_v40  ;;  %1366 = vmatpush3.msra.mxu1 %v82_v41  ;;  %v40_v40 = vld [vmem:[%s2627_s3] sm:$0xff] }
  0xc7   :  { %1329 = vmatprep.subr.mxu0 %v65_v42  ;;  %1367 = vmatprep.subr.mxu1 %v97_v43  ;;  %v41_v43 = vld [vmem:[%s2628_s4] sm:$0xff] }
  0xc8   :  { %1330 = vmatpush3.msra.mxu0 %v49_v44  ;;  %1368 = vmatpush3.msra.mxu1 %v81_v45 }
  0xc9   :  { %1331 = vmatprep.subr.mxu0 %v64_v46  ;;  %1369 = vmatprep.subr.mxu1 %v96_v47 }
  0xca   :  { %1332 = vmatpush3.msra.mxu0 %v48_v48  ;;  %1370 = vmatpush3.msra.mxu1 %v80_v49 }
  0xcb   :  { %1333 = vmatprep.subr.mxu0 %v63_v50  ;;  %1371 = vmatprep.subr.mxu1 %v95_v51 }
  0xcc   :  { %1334 = vmatpush3.msra.mxu0 %v47_v52  ;;  %1372 = vmatpush3.msra.mxu1 %v79_v53 }
  0xcd   :  { %1335 = vmatprep.subr.mxu0 %v62_v54  ;;  %1373 = vmatprep.subr.mxu1 %v94_v55 }
  0xce   :  { %1336 = vmatpush3.msra.mxu0 %v46_v56  ;;  %1374 = vmatpush3.msra.mxu1 %v78_v57 }
  0xcf   :  { %1337 = vmatprep.subr.mxu0 %v61_v58  ;;  %1375 = vmatprep.subr.mxu1 %v93_v59 }
  0xd0   :  { %1338 = vmatpush3.msra.mxu0 %v45_v60  ;;  %1376 = vmatpush3.msra.mxu1 %v77_v61 }
  0xd1   :  { %1339 = vmatprep.subr.mxu0 %v60_v62  ;;  %1377 = vmatprep.subr.mxu1 %v92_v63 }
  0xd2   :  { %1340 = vmatpush3.msra.mxu0 %v44_v5  ;;  %1378 = vmatpush3.msra.mxu1 %v76_v7 }
  0xd3   :  { %1341 = vmatprep.subr.mxu0 %v59_v8  ;;  %1379 = vmatprep.subr.mxu1 %v91_v9 }
  0xd4   :  { %1342 = vmatpush3.msra.mxu0 %v43_v10  ;;  %1380 = vmatpush3.msra.mxu1 %v75_v11 }
  0xd5   :  { %1343 = vmatprep.subr.mxu0 %v58_v12  ;;  %1381 = vmatprep.subr.mxu1 %v90_v13 }
  0xd6   :  { %1344 = vmatpush3.msra.mxu0 %v42_v14  ;;  %1382 = vmatpush3.msra.mxu1 %v74_v15 }
  0xd7   :  { %1545 = vset.pattern.permute.xlu0 %v1590_v20  ;;  %1546 = vset.pattern.permute.xlu1 %v1590_v20 }
 0x176   :  { %v282_v16 = vpop.f32.mrf.mxu0  ;;  %v353_v2 = vpop.f32.mrf.mxu1 }
 0x177   :  { %v358_v18 = vmul.f32 %v282_v16, %v282_v16  ;;  %v360_v19 = vmul.f32 %v353_v2, %v353_v2 }
 0x178   :  { %v284_v3 = vpop.f32.mrf.mxu0  ;;  %v355_v0 = vpop.f32.mrf.mxu1 }
 0x179   :  { %v359_v1 = vmul.f32 %v284_v3, %v284_v3  ;;  %v361_v17 = vmul.f32 %v355_v0, %v355_v0  ;;  %426 = vmatprep.mubr.f32.mxu0 %v284_v3  ;;  %501 = vmatprep.mubr.f32.mxu1 %v355_v0 }
 0x17a   :  { %427 = vmatmul.mubr.f32.vlgmr.msra.gmra.mxu0 %v282_v16  ;;  %502 = vmatmul.mubr.f32.vlgmr.msra.gmra.mxu1 %v353_v2 }
 0x17b   :  { %431 = vmatprep.mubr.f32.mxu0 %v359_v1  ;;  %506 = vmatprep.mubr.f32.mxu1 %v361_v17 }
 0x17e   :  { %432 = vmatmul.mubr.f32.gmra.mxu0 %v358_v18  ;;  %507 = vmatmul.mubr.f32.gmra.mxu1 %v360_v19 }
 0x17f   :  { %781 = vmatprep.mubr.f32.mxu0 %v1588_v4  ;;  %852 = vmatprep.mubr.f32.mxu1 %v1588_v4 }
 0x23a   :  { %v1345_v21 = vpop.f32.mrf.mxu0  ;;  %v1383_v22 = vpop.f32.mrf.mxu1 }
 0x23c   :  { %v1346_v23 = vpop.f32.mrf.mxu0  ;;  %v1384_v24 = vpop.f32.mrf.mxu1 }
 0x23d   :  { %v1347_v25 = vadd.f32 %v1346_v23, %v1345_v21  ;;  %v1385_v26 = vadd.f32 %v1384_v24, %v1383_v22 }
 0x23e   :  { %v1348_v27 = vpop.f32.mrf.mxu0  ;;  %v1386_v28 = vpop.f32.mrf.mxu1 }
 0x23f   :  { %v504_v29 = vadd.f32 %v1385_v26, %v1347_v25 }
 0x240   :  { %v1349_v30 = vpop.f32.mrf.mxu0  ;;  %v1387_v31 = vpop.f32.mrf.mxu1 }
 0x241   :  { %v512_v32 = vmul.f32 0.0025510204, %v504_v29  ;;  %v1350_v33 = vadd.f32 %v1349_v30, %v1348_v27  ;;  %v1388_v34 = vadd.f32 %v1387_v31, %v1386_v28 }
 0x243   :  { %v509_v35 = vadd.f32 %v1388_v34, %v1350_v33  ;;  %522 = vperm.xlu0 %1545, %v512_v32   ;;  %v514_v4 = vmul.f32 %v512_v32, %v512_v32 }
 0x245   :  { %v513_v36 = vmul.f32 0.0025510204, %v509_v35 }
 0x247   :  { %v515_v37 = vsub.f32 %v513_v36, %v514_v4 }
 0x249   :  { %v516_v38 = vmax.f32 %v515_v37, 0.0 }
 0x24b   :  { %v517_v39 = vadd.f32 1e-05, %v516_v38 }
 0x24d   :  { %1577 = vrsqrt.f32 %v517_v39 }
 0x25a   :  { %v1578_v41 = vpop.eup %1577 }
 0x25b   :  { %v519_v42 = vmul.f32 %v1578_v41, %v40_v40 }
 0x25d   :  { %531 = vperm.xlu1 %1546, %v519_v42  }
 0x261   :  { %540 = vperm.xlu1 %1546, %v41_v43  }
 0x2be   :  { %v523_v44 = vpop.permute.xlu0 %522 }
 0x2bf   :  { %v525_v46 = vsub.f32 %v282_v16, %v523_v44  ;;  %v526_v47 = vsub.f32 %v284_v3, %v523_v44  ;;  %v527_v48 = vsub.f32 %v353_v2, %v523_v44  ;;  %v528_v49 = vsub.f32 %v355_v0, %v523_v44 }
 0x2d8   :  { %v532_v45 = vpop.permute.xlu1 %531 }
 0x2d9   :  { %v534_v50 = vmul.f32 %v532_v45, %v525_v46  ;;  %v535_v51 = vmul.f32 %v532_v45, %v526_v47  ;;  %v536_v53 = vmul.f32 %v532_v45, %v527_v48  ;;  %v537_v54 = vmul.f32 %v532_v45, %v528_v49 }
 0x2dc   :  { %v541_v52 = vpop.permute.xlu1 %540 }
 0x2dd   :  { %v543_v55 = vadd.f32 %v541_v52, %v534_v50  ;;  %v544_v56 = vadd.f32 %v541_v52, %v535_v51  ;;  %v545_v57 = vadd.f32 %v541_v52, %v536_v53  ;;  %v546_v58 = vadd.f32 %v541_v52, %v537_v54 }
 0x2df   :  { %v2015_v59 = vmax.f32 %v543_v55, 0.0  ;;  %v2017_v60 = vmax.f32 %v544_v56, 0.0  ;;  %v2023_v61 = vmax.f32 %v545_v57, 0.0  ;;  %v2025_v62 = vmax.f32 %v546_v58, 0.0 }
 0x2e1   :  { %704 = vrot.lane.b32.xlu1 %v2017_v60, %s1581_s17  ;;  %702 = vrot.lane.b32.xlu0 %v2015_v59, %s1581_s17 }
 0x2e5   :  { %708 = vrot.lane.b32.xlu1 %v2025_v62, %s1581_s17  ;;  %706 = vrot.lane.b32.xlu0 %v2023_v61, %s1581_s17 }
 0x2e9   :  { %692 = vrot.lane.b32.xlu1 %v2017_v60, %s1582_s22  ;;  %690 = vrot.lane.b32.xlu0 %v2015_v59, %s1582_s22 }
 0x2ed   :  { %696 = vrot.lane.b32.xlu1 %v2025_v62, %s1582_s22  ;;  %694 = vrot.lane.b32.xlu0 %v2023_v61, %s1582_s22 }
 0x2f1   :  { %680 = vrot.lane.b32.xlu1 %v2017_v60, %s1583_s0  ;;  %678 = vrot.lane.b32.xlu0 %v2015_v59, %s1583_s0 }
 0x2f5   :  { %684 = vrot.lane.b32.xlu1 %v2025_v62, %s1583_s0  ;;  %682 = vrot.lane.b32.xlu0 %v2023_v61, %s1583_s0 }
 0x2f9   :  { %668 = vrot.lane.b32.xlu1 %v2017_v60, %s1584_s23  ;;  %666 = vrot.lane.b32.xlu0 %v2015_v59, %s1584_s23 }
 0x2fd   :  { %672 = vrot.lane.b32.xlu1 %v2025_v62, %s1584_s23  ;;  %670 = vrot.lane.b32.xlu0 %v2023_v61, %s1584_s23 }
 0x301   :  { %656 = vrot.lane.b32.xlu1 %v2017_v60, %s1585_s24  ;;  %654 = vrot.lane.b32.xlu0 %v2015_v59, %s1585_s24 }
 0x305   :  { %660 = vrot.lane.b32.xlu1 %v2025_v62, %s1585_s24  ;;  %658 = vrot.lane.b32.xlu0 %v2023_v61, %s1585_s24 }
 0x309   :  { %644 = vrot.lane.b32.xlu1 %v2017_v60, %s1586_s25  ;;  %642 = vrot.lane.b32.xlu0 %v2015_v59, %s1586_s25 }
 0x30d   :  { %648 = vrot.lane.b32.xlu1 %v2025_v62, %s1586_s25  ;;  %646 = vrot.lane.b32.xlu0 %v2023_v61, %s1586_s25 }
 0x311   :  { %632 = vrot.lane.b32.xlu1 %v2017_v60, %s1587_s26  ;;  %630 = vrot.lane.b32.xlu0 %v2015_v59, %s1587_s26 }
 0x315   :  { %636 = vrot.lane.b32.xlu1 %v2025_v62, %s1587_s26  ;;  %634 = vrot.lane.b32.xlu0 %v2023_v61, %s1587_s26 }
 0x319   :  { %620 = vrot.lane.b32.xlu1 %v2017_v60, %s1589_s27  ;;  %618 = vrot.lane.b32.xlu0 %v2015_v59, %s1589_s27 }
 0x31d   :  { %624 = vrot.lane.b32.xlu1 %v2025_v62, %s1589_s27  ;;  %622 = vrot.lane.b32.xlu0 %v2023_v61, %s1589_s27 }
 0x353   :  { %v705_v63 = vpop.permute.xlu1 %704  ;;  %v703_v5 = vpop.permute.xlu0 %702 }
 0x354   :  { %v712_v12 = vsel %vm207_vm0, %v703_v5, %v705_v63 }
 0x357   :  { %v709_v7 = vpop.permute.xlu1 %708  ;;  %v707_v8 = vpop.permute.xlu0 %706 }
 0x358   :  { %v710_v9 = vsel %vm207_vm0, %v707_v8, %v709_v7  ;;  %v711_v10 = vsel %vm207_vm0, %v705_v63, %v707_v8  ;;  %v713_v11 = vsel %vm207_vm0, %v709_v7, %v703_v5 }
 0x359   :  { %731 = vmatprep.subr.mxu0 %v711_v10  ;;  %802 = vmatprep.subr.mxu1 %v713_v11  ;;  %v551_v10 = vld [vmem:[%s2629_s2] sm:$0xff]  ;;  %v585_v11 = vld [vmem:[%s2630_s8 + $0xf8] sm:$0xff] }
 0x35a   :  { %732 = vmatpush1.msra.mxu0 %v712_v12  ;;  %803 = vmatpush1.msra.mxu1 %v710_v9  ;;  %v617_v12 = vld [vmem:[%s2630_s8 + $0x1f8] sm:$0xff] }
 0x35b   :  { %v693_v13 = vpop.permute.xlu1 %692  ;;  %v691_v14 = vpop.permute.xlu0 %690 }
 0x35c   :  { %v700_v1 = vsel %vm194_vm1, %v691_v14, %v693_v13 }
 0x35f   :  { %v697_v15 = vpop.permute.xlu1 %696  ;;  %v695_v16 = vpop.permute.xlu0 %694 }
 0x360   :  { %v698_v2 = vsel %vm194_vm1, %v695_v16, %v697_v15  ;;  %v699_v3 = vsel %vm194_vm1, %v693_v13, %v695_v16  ;;  %v701_v0 = vsel %vm194_vm1, %v697_v15, %v691_v14  ;;  %v569_v13 = vld [vmem:[%s2630_s8 + $0x78] sm:$0xff]  ;;  %v600_v14 = vld [vmem:[%s2630_s8 + $0x170] sm:$0xff]  ;;  %v583_v15 = vld [vmem:[%s2630_s8 + $0xe8] sm:$0xff] }
 0x361   :  { %733 = vmatprep.subr.mxu0 %v699_v3  ;;  %804 = vmatprep.subr.mxu1 %v701_v0  ;;  %v615_v16 = vld [vmem:[%s2630_s8 + $0x1e8] sm:$0xff]  ;;  %v582_v0 = vld [vmem:[%s2630_s8 + $0xe0] sm:$0xff] }
 0x362   :  { %734 = vmatpush1.msra.mxu0 %v700_v1  ;;  %805 = vmatpush1.msra.mxu1 %v698_v2  ;;  %v567_v2 = vld [vmem:[%s2630_s8 + $0x68] sm:$0xff]  ;;  %v614_v1 = vld [vmem:[%s2630_s8 + $0x1e0] sm:$0xff] }
 0x363   :  { %v681_v17 = vpop.permute.xlu1 %680  ;;  %v679_v18 = vpop.permute.xlu0 %678  ;;  %v599_v3 = vld [vmem:[%s2630_s8 + $0x168] sm:$0xff] }
 0x364   :  { %v688_v24 = vsel %vm181_vm2, %v679_v18, %v681_v17 }
 0x367   :  { %v685_v19 = vpop.permute.xlu1 %684  ;;  %v683_v20 = vpop.permute.xlu0 %682 }
 0x368   :  { %v686_v21 = vsel %vm181_vm2, %v683_v20, %v685_v19  ;;  %v687_v22 = vsel %vm181_vm2, %v681_v17, %v683_v20  ;;  %v689_v23 = vsel %vm181_vm2, %v685_v19, %v679_v18  ;;  %v566_v17 = vld [vmem:[%s2630_s8 + $0x60] sm:$0xff]  ;;  %v581_v19 = vld [vmem:[%s2630_s8 + $0xd8] sm:$0xff] }
 0x369   :  { %735 = vmatprep.subr.mxu0 %v687_v22  ;;  %806 = vmatprep.subr.mxu1 %v689_v23  ;;  %v598_v18 = vld [vmem:[%s2630_s8 + $0x160] sm:$0xff]  ;;  %v613_v20 = vld [vmem:[%s2630_s8 + $0x1d8] sm:$0xff]  ;;  %v580_v23 = vld [vmem:[%s2630_s8 + $0xd0] sm:$0xff] }
 0x36a   :  { %736 = vmatpush1.msra.mxu0 %v688_v24  ;;  %807 = vmatpush1.msra.mxu1 %v686_v21  ;;  %v565_v21 = vld [vmem:[%s2630_s8 + $0x58] sm:$0xff]  ;;  %v612_v24 = vld [vmem:[%s2630_s8 + $0x1d0] sm:$0xff] }
 0x36b   :  { %v669_v25 = vpop.permute.xlu1 %668  ;;  %v667_v26 = vpop.permute.xlu0 %666  ;;  %v597_v22 = vld [vmem:[%s2630_s8 + $0x158] sm:$0xff] }
 0x36c   :  { %v676_v32 = vsel %vm168_vm3, %v667_v26, %v669_v25 }
 0x36f   :  { %v673_v27 = vpop.permute.xlu1 %672  ;;  %v671_v28 = vpop.permute.xlu0 %670 }
 0x370   :  { %v674_v29 = vsel %vm168_vm3, %v671_v28, %v673_v27  ;;  %v675_v30 = vsel %vm168_vm3, %v669_v25, %v671_v28  ;;  %v677_v31 = vsel %vm168_vm3, %v673_v27, %v667_v26  ;;  %v564_v25 = vld [vmem:[%s2630_s8 + $0x50] sm:$0xff]  ;;  %v579_v27 = vld [vmem:[%s2630_s8 + $0xc8] sm:$0xff] }
 0x371   :  { %737 = vmatprep.subr.mxu0 %v675_v30  ;;  %808 = vmatprep.subr.mxu1 %v677_v31  ;;  %v596_v26 = vld [vmem:[%s2630_s8 + $0x150] sm:$0xff]  ;;  %v611_v28 = vld [vmem:[%s2630_s8 + $0x1c8] sm:$0xff]  ;;  %v578_v31 = vld [vmem:[%s2630_s8 + $0xc0] sm:$0xff] }
 0x372   :  { %738 = vmatpush1.msra.mxu0 %v676_v32  ;;  %809 = vmatpush1.msra.mxu1 %v674_v29  ;;  %v563_v29 = vld [vmem:[%s2630_s8 + $0x48] sm:$0xff]  ;;  %v610_v32 = vld [vmem:[%s2630_s8 + $0x1c0] sm:$0xff] }
 0x373   :  { %v657_v33 = vpop.permute.xlu1 %656  ;;  %v655_v34 = vpop.permute.xlu0 %654  ;;  %v595_v30 = vld [vmem:[%s2630_s8 + $0x148] sm:$0xff] }
 0x374   :  { %v664_v39 = vsel %vm155_vm4, %v655_v34, %v657_v33 }
 0x377   :  { %v661_v35 = vpop.permute.xlu1 %660  ;;  %v659_v4 = vpop.permute.xlu0 %658 }
 0x378   :  { %v662_v36 = vsel %vm155_vm4, %v659_v4, %v661_v35  ;;  %v663_v37 = vsel %vm155_vm4, %v657_v33, %v659_v4  ;;  %v665_v38 = vsel %vm155_vm4, %v661_v35, %v655_v34  ;;  %v562_v33 = vld [vmem:[%s2630_s8 + $0x40] sm:$0xff]  ;;  %v577_v35 = vld [vmem:[%s2630_s8 + $0xb8] sm:$0xff] }
 0x379   :  { %739 = vmatprep.subr.mxu0 %v663_v37  ;;  %810 = vmatprep.subr.mxu1 %v665_v38  ;;  %v594_v34 = vld [vmem:[%s2630_s8 + $0x140] sm:$0xff]  ;;  %v609_v4 = vld [vmem:[%s2630_s8 + $0x1b8] sm:$0xff]  ;;  %v576_v38 = vld [vmem:[%s2630_s8 + $0xb0] sm:$0xff] }
 0x37a   :  { %740 = vmatpush1.msra.mxu0 %v664_v39  ;;  %811 = vmatpush1.msra.mxu1 %v662_v36  ;;  %v561_v36 = vld [vmem:[%s2630_s8 + $0x38] sm:$0xff]  ;;  %v608_v39 = vld [vmem:[%s2630_s8 + $0x1b0] sm:$0xff] }
 0x37b   :  { %v645_v40 = vpop.permute.xlu1 %644  ;;  %v643_v41 = vpop.permute.xlu0 %642  ;;  %v593_v37 = vld [vmem:[%s2630_s8 + $0x138] sm:$0xff] }
 0x37c   :  { %v652_v47 = vsel %vm142_vm5, %v643_v41, %v645_v40 }
 0x37f   :  { %v649_v42 = vpop.permute.xlu1 %648  ;;  %v647_v43 = vpop.permute.xlu0 %646 }
 0x380   :  { %v650_v44 = vsel %vm142_vm5, %v647_v43, %v649_v42  ;;  %v651_v45 = vsel %vm142_vm5, %v645_v40, %v647_v43  ;;  %v653_v46 = vsel %vm142_vm5, %v649_v42, %v643_v41  ;;  %v560_v40 = vld [vmem:[%s2630_s8 + $0x30] sm:$0xff]  ;;  %v575_v42 = vld [vmem:[%s2630_s8 + $0xa8] sm:$0xff] }
 0x381   :  { %741 = vmatprep.subr.mxu0 %v651_v45  ;;  %812 = vmatprep.subr.mxu1 %v653_v46  ;;  %v592_v41 = vld [vmem:[%s2630_s8 + $0x130] sm:$0xff]  ;;  %v607_v43 = vld [vmem:[%s2630_s8 + $0x1a8] sm:$0xff]  ;;  %v574_v46 = vld [vmem:[%s2630_s8 + $0xa0] sm:$0xff] }
 0x382   :  { %742 = vmatpush1.msra.mxu0 %v652_v47  ;;  %813 = vmatpush1.msra.mxu1 %v650_v44  ;;  %v559_v44 = vld [vmem:[%s2630_s8 + $0x28] sm:$0xff]  ;;  %v606_v47 = vld [vmem:[%s2630_s8 + $0x1a0] sm:$0xff] }
 0x383   :  { %v633_v48 = vpop.permute.xlu1 %632  ;;  %v631_v49 = vpop.permute.xlu0 %630  ;;  %v591_v45 = vld [vmem:[%s2630_s8 + $0x128] sm:$0xff] }
 0x384   :  { %v640_v55 = vsel %vm129_vm6, %v631_v49, %v633_v48 }
 0x387   :  { %v637_v50 = vpop.permute.xlu1 %636  ;;  %v635_v51 = vpop.permute.xlu0 %634 }
 0x388   :  { %v638_v52 = vsel %vm129_vm6, %v635_v51, %v637_v50  ;;  %v639_v53 = vsel %vm129_vm6, %v633_v48, %v635_v51  ;;  %v641_v54 = vsel %vm129_vm6, %v637_v50, %v631_v49  ;;  %v558_v48 = vld [vmem:[%s2630_s8 + $0x20] sm:$0xff]  ;;  %v573_v50 = vld [vmem:[%s2630_s8 + $0x98] sm:$0xff] }
 0x389   :  { %743 = vmatprep.subr.mxu0 %v639_v53  ;;  %814 = vmatprep.subr.mxu1 %v641_v54  ;;  %v590_v49 = vld [vmem:[%s2630_s8 + $0x120] sm:$0xff]  ;;  %v605_v51 = vld [vmem:[%s2630_s8 + $0x198] sm:$0xff]  ;;  %v572_v54 = vld [vmem:[%s2630_s8 + $0x90] sm:$0xff] }
 0x38a   :  { %744 = vmatpush1.msra.mxu0 %v640_v55  ;;  %815 = vmatpush1.msra.mxu1 %v638_v52  ;;  %v557_v52 = vld [vmem:[%s2630_s8 + $0x18] sm:$0xff]  ;;  %v604_v55 = vld [vmem:[%s2630_s8 + $0x190] sm:$0xff] }
 0x38b   :  { %v621_v56 = vpop.permute.xlu1 %620  ;;  %v619_v57 = vpop.permute.xlu0 %618  ;;  %v589_v53 = vld [vmem:[%s2630_s8 + $0x118] sm:$0xff] }
 0x38c   :  { %v628_v9 = vsel %vm116_vm7, %v619_v57, %v621_v56 }
 0x38f   :  { %v625_v58 = vpop.permute.xlu1 %624  ;;  %v623_v63 = vpop.permute.xlu0 %622 }
 0x390   :  { %v626_v5 = vsel %vm116_vm7, %v623_v63, %v625_v58  ;;  %v627_v7 = vsel %vm116_vm7, %v621_v56, %v623_v63  ;;  %v629_v8 = vsel %vm116_vm7, %v625_v58, %v619_v57  ;;  %v556_v56 = vld [vmem:[%s2630_s8 + $0x10] sm:$0xff]  ;;  %v571_v58 = vld [vmem:[%s2630_s8 + $0x88] sm:$0xff] }
 0x391   :  { %745 = vmatprep.subr.mxu0 %v627_v7  ;;  %816 = vmatprep.subr.mxu1 %v629_v8  ;;  %v588_v57 = vld [vmem:[%s2630_s8 + $0x110] sm:$0xff]  ;;  %v603_v63 = vld [vmem:[%s2630_s8 + $0x188] sm:$0xff]  ;;  %v570_v8 = vld [vmem:[%s2630_s8 + $0x80] sm:$0xff] }
 0x392   :  { %746 = vmatpush1.msra.mxu0 %v628_v9  ;;  %817 = vmatpush1.msra.mxu1 %v626_v5  ;;  %v555_v5 = vld [vmem:[%s2630_s8 + $0x8] sm:$0xff]  ;;  %v602_v9 = vld [vmem:[%s2630_s8 + $0x180] sm:$0xff] }
 0x393   :  { %747 = vmatprep.subr.mxu0 %v2017_v60  ;;  %818 = vmatprep.subr.mxu1 %v2025_v62  ;;  %v601_v60 = vld [vmem:[%s2630_s8 + $0x178] sm:$0xff]  ;;  %v584_v62 = vld [vmem:[%s2630_s8 + $0xf0] sm:$0xff]  ;;  %v587_v7 = vld [vmem:[%s2630_s8 + $0x108] sm:$0xff] }
 0x394   :  { %748 = vmatpush1.msra.mxu0 %v2015_v59  ;;  %819 = vmatpush1.msra.mxu1 %v2023_v61  ;;  %v616_v59 = vld [vmem:[%s2630_s8 + $0x1f0] sm:$0xff] }
 0x395   :  { %1311 = vmatmul.mubr.msk.f32.vlgmr.msra.gmra.mxu0 %vm212_vm8, %v551_v10  ;;  %1312 = vmatmul.mubr.msk.f32.vlgmr.msra.gmra.mxu1 %vm212_vm8, %v551_v10  ;;  %v568_v61 = vld [vmem:[%s2630_s8 + $0x70] sm:$0xff]  ;;  %v554_v10 = vld [vmem:[%s2630_s8] sm:$0xff] }
 0x396   :  { %1389 = vmatprep.subr.mxu0 %v585_v11  ;;  %1427 = vmatprep.subr.mxu1 %v617_v12  ;;  %v586_v11 = vld [vmem:[%s2630_s8 + $0x100] sm:$0xff] }
 0x397   :  { %1390 = vmatpush3.msra.mxu0 %v569_v13  ;;  %1428 = vmatpush3.msra.mxu1 %v601_v60 }
 0x398   :  { %1391 = vmatprep.subr.mxu0 %v584_v62  ;;  %1429 = vmatprep.subr.mxu1 %v616_v59 }
 0x399   :  { %1392 = vmatpush3.msra.mxu0 %v568_v61  ;;  %1430 = vmatpush3.msra.mxu1 %v600_v14 }
 0x39a   :  { %1393 = vmatprep.subr.mxu0 %v583_v15  ;;  %1431 = vmatprep.subr.mxu1 %v615_v16 }
 0x39b   :  { %1394 = vmatpush3.msra.mxu0 %v567_v2  ;;  %1432 = vmatpush3.msra.mxu1 %v599_v3 }
 0x39c   :  { %1395 = vmatprep.subr.mxu0 %v582_v0  ;;  %1433 = vmatprep.subr.mxu1 %v614_v1 }
 0x39d   :  { %1396 = vmatpush3.msra.mxu0 %v566_v17  ;;  %1434 = vmatpush3.msra.mxu1 %v598_v18 }
 0x39e   :  { %1397 = vmatprep.subr.mxu0 %v581_v19  ;;  %1435 = vmatprep.subr.mxu1 %v613_v20 }
 0x39f   :  { %1398 = vmatpush3.msra.mxu0 %v565_v21  ;;  %1436 = vmatpush3.msra.mxu1 %v597_v22 }
 0x3a0   :  { %1399 = vmatprep.subr.mxu0 %v580_v23  ;;  %1437 = vmatprep.subr.mxu1 %v612_v24 }
 0x3a1   :  { %1400 = vmatpush3.msra.mxu0 %v564_v25  ;;  %1438 = vmatpush3.msra.mxu1 %v596_v26 }
 0x3a2   :  { %1401 = vmatprep.subr.mxu0 %v579_v27  ;;  %1439 = vmatprep.subr.mxu1 %v611_v28  ;;  %v553_v27 = vld [vmem:[%s2631_s6] sm:$0xff] }
 0x3a3   :  { %1402 = vmatpush3.msra.mxu0 %v563_v29  ;;  %1440 = vmatpush3.msra.mxu1 %v595_v30 }
 0x3a4   :  { %1403 = vmatprep.subr.mxu0 %v578_v31  ;;  %1441 = vmatprep.subr.mxu1 %v610_v32 }
 0x3a5   :  { %1404 = vmatpush3.msra.mxu0 %v562_v33  ;;  %1442 = vmatpush3.msra.mxu1 %v594_v34  ;;  %v552_v33 = vld [vmem:[%s2632_s5] sm:$0xff] }
 0x3a6   :  { %1405 = vmatprep.subr.mxu0 %v577_v35  ;;  %1443 = vmatprep.subr.mxu1 %v609_v4  ;;  %v1131_v4 = vld [vmem:[%s2633_s9 + $0xf8] sm:$0xff] }
 0x3a7   :  { %1406 = vmatpush3.msra.mxu0 %v561_v36  ;;  %1444 = vmatpush3.msra.mxu1 %v593_v37  ;;  %v1163_v36 = vld [vmem:[%s2633_s9 + $0x1f8] sm:$0xff] }
 0x3a8   :  { %1407 = vmatprep.subr.mxu0 %v576_v38  ;;  %1445 = vmatprep.subr.mxu1 %v608_v39  ;;  %v1115_v37 = vld [vmem:[%s2633_s9 + $0x78] sm:$0xff]  ;;  %v1130_v39 = vld [vmem:[%s2633_s9 + $0xf0] sm:$0xff] }
 0x3a9   :  { %1408 = vmatpush3.msra.mxu0 %v560_v40  ;;  %1446 = vmatpush3.msra.mxu1 %v592_v41  ;;  %v1147_v38 = vld [vmem:[%s2633_s9 + $0x178] sm:$0xff]  ;;  %v1162_v40 = vld [vmem:[%s2633_s9 + $0x1f0] sm:$0xff] }
 0x3aa   :  { %1409 = vmatprep.subr.mxu0 %v575_v42  ;;  %1447 = vmatprep.subr.mxu1 %v607_v43  ;;  %v1114_v41 = vld [vmem:[%s2633_s9 + $0x70] sm:$0xff]  ;;  %v1129_v43 = vld [vmem:[%s2633_s9 + $0xe8] sm:$0xff] }
 0x3ab   :  { %1410 = vmatpush3.msra.mxu0 %v559_v44  ;;  %1448 = vmatpush3.msra.mxu1 %v591_v45  ;;  %v1146_v42 = vld [vmem:[%s2633_s9 + $0x170] sm:$0xff]  ;;  %v1161_v44 = vld [vmem:[%s2633_s9 + $0x1e8] sm:$0xff] }
 0x3ac   :  { %1411 = vmatprep.subr.mxu0 %v574_v46  ;;  %1449 = vmatprep.subr.mxu1 %v606_v47  ;;  %v1113_v45 = vld [vmem:[%s2633_s9 + $0x68] sm:$0xff]  ;;  %v1128_v47 = vld [vmem:[%s2633_s9 + $0xe0] sm:$0xff] }
 0x3ad   :  { %1412 = vmatpush3.msra.mxu0 %v558_v48  ;;  %1450 = vmatpush3.msra.mxu1 %v590_v49  ;;  %v1145_v46 = vld [vmem:[%s2633_s9 + $0x168] sm:$0xff]  ;;  %v1160_v48 = vld [vmem:[%s2633_s9 + $0x1e0] sm:$0xff] }
 0x3ae   :  { %1413 = vmatprep.subr.mxu0 %v573_v50  ;;  %1451 = vmatprep.subr.mxu1 %v605_v51  ;;  %v1112_v49 = vld [vmem:[%s2633_s9 + $0x60] sm:$0xff]  ;;  %v1127_v51 = vld [vmem:[%s2633_s9 + $0xd8] sm:$0xff] }
 0x3af   :  { %1414 = vmatpush3.msra.mxu0 %v557_v52  ;;  %1452 = vmatpush3.msra.mxu1 %v589_v53  ;;  %v1144_v50 = vld [vmem:[%s2633_s9 + $0x160] sm:$0xff]  ;;  %v1159_v52 = vld [vmem:[%s2633_s9 + $0x1d8] sm:$0xff] }
 0x3b0   :  { %1415 = vmatprep.subr.mxu0 %v572_v54  ;;  %1453 = vmatprep.subr.mxu1 %v604_v55  ;;  %v1111_v53 = vld [vmem:[%s2633_s9 + $0x58] sm:$0xff]  ;;  %v1126_v55 = vld [vmem:[%s2633_s9 + $0xd0] sm:$0xff] }
 0x3b1   :  { %1416 = vmatpush3.msra.mxu0 %v556_v56  ;;  %1454 = vmatpush3.msra.mxu1 %v588_v57  ;;  %v1143_v54 = vld [vmem:[%s2633_s9 + $0x158] sm:$0xff]  ;;  %v1158_v56 = vld [vmem:[%s2633_s9 + $0x1d0] sm:$0xff] }
 0x3b2   :  { %1417 = vmatprep.subr.mxu0 %v571_v58  ;;  %1455 = vmatprep.subr.mxu1 %v603_v63  ;;  %v1110_v57 = vld [vmem:[%s2633_s9 + $0x50] sm:$0xff]  ;;  %v1125_v63 = vld [vmem:[%s2633_s9 + $0xc8] sm:$0xff] }
 0x3b3   :  { %1418 = vmatpush3.msra.mxu0 %v555_v5  ;;  %1456 = vmatpush3.msra.mxu1 %v587_v7  ;;  %v1142_v58 = vld [vmem:[%s2633_s9 + $0x150] sm:$0xff]  ;;  %v1157_v5 = vld [vmem:[%s2633_s9 + $0x1c8] sm:$0xff] }
 0x3b4   :  { %1419 = vmatprep.subr.mxu0 %v570_v8  ;;  %1457 = vmatprep.subr.mxu1 %v602_v9  ;;  %v1109_v7 = vld [vmem:[%s2633_s9 + $0x48] sm:$0xff]  ;;  %v1124_v9 = vld [vmem:[%s2633_s9 + $0xc0] sm:$0xff] }
 0x3b5   :  { %1420 = vmatpush3.msra.mxu0 %v554_v10  ;;  %1458 = vmatpush3.msra.mxu1 %v586_v11  ;;  %v1141_v8 = vld [vmem:[%s2633_s9 + $0x148] sm:$0xff]  ;;  %v1156_v10 = vld [vmem:[%s2633_s9 + $0x1c0] sm:$0xff] }
 0x3b6   :  { %1465 = vmatprep.subr.mxu0 %v1131_v4  ;;  %1500 = vmatprep.subr.mxu1 %v1163_v36  ;;  %v1108_v11 = vld [vmem:[%s2633_s9 + $0x40] sm:$0xff]  ;;  %v1119_v4 = vld [vmem:[%s2633_s9 + $0x98] sm:$0xff] }
 0x3b7   :  { %v1151_v36 = vld [vmem:[%s2633_s9 + $0x198] sm:$0xff] }
 0x455   :  { %v2352_v12 = vpop.f32.mrf.mxu0  ;;  %v2354_v13 = vpop.f32.mrf.mxu1 }
 0x456   :  { %v859_v14 = vmul.f32 %v2352_v12, %v2352_v12  ;;  %v861_v15 = vmul.f32 %v2354_v13, %v2354_v13 }
 0x457   :  { %v2356_v60 = vpop.f32.mrf.mxu0  ;;  %v2358_v62 = vpop.f32.mrf.mxu1 }
 0x458   :  { %v860_v59 = vmul.f32 %v2356_v60, %v2356_v60  ;;  %v862_v61 = vmul.f32 %v2358_v62, %v2358_v62  ;;  %927 = vmatprep.mubr.f32.mxu0 %v2356_v60  ;;  %1002 = vmatprep.mubr.f32.mxu1 %v2358_v62 }
 0x459   :  { %928 = vmatmul.mubr.f32.vlgmr.msra.gmra.mxu0 %v2352_v12  ;;  %1003 = vmatmul.mubr.f32.vlgmr.msra.gmra.mxu1 %v2354_v13 }
 0x45a   :  { %932 = vmatprep.mubr.f32.mxu0 %v860_v59  ;;  %1007 = vmatprep.mubr.f32.mxu1 %v862_v61  ;;  %v1140_v59 = vld [vmem:[%s2633_s9 + $0x140] sm:$0xff] }
 0x45b   :  { %1466 = vmatpush3.msra.mxu0 %v1115_v37  ;;  %1501 = vmatpush3.msra.mxu1 %v1147_v38 }
 0x45c   :  { %1467 = vmatprep.subr.mxu0 %v1130_v39  ;;  %1502 = vmatprep.subr.mxu1 %v1162_v40 }
 0x45d   :  { %933 = vmatmul.mubr.f32.gmra.mxu0 %v859_v14  ;;  %1008 = vmatmul.mubr.f32.gmra.mxu1 %v861_v15  ;;  %v1123_v14 = vld [vmem:[%s2633_s9 + $0xb8] sm:$0xff] }
 0x45e   :  { %1468 = vmatpush3.msra.mxu0 %v1114_v41  ;;  %1503 = vmatpush3.msra.mxu1 %v1146_v42  ;;  %v1155_v15 = vld [vmem:[%s2633_s9 + $0x1b8] sm:$0xff] }
 0x45f   :  { %1469 = vmatprep.subr.mxu0 %v1129_v43  ;;  %1504 = vmatprep.subr.mxu1 %v1161_v44  ;;  %v1103_v41 = vld [vmem:[%s2633_s9 + $0x18] sm:$0xff]  ;;  %v1118_v43 = vld [vmem:[%s2633_s9 + $0x90] sm:$0xff] }
 0x460   :  { %1470 = vmatpush3.msra.mxu0 %v1113_v45  ;;  %1505 = vmatpush3.msra.mxu1 %v1145_v46  ;;  %v1135_v42 = vld [vmem:[%s2633_s9 + $0x118] sm:$0xff]  ;;  %v1150_v46 = vld [vmem:[%s2633_s9 + $0x190] sm:$0xff] }
 0x461   :  { %1471 = vmatprep.subr.mxu0 %v1128_v47  ;;  %1506 = vmatprep.subr.mxu1 %v1160_v48  ;;  %v1102_v47 = vld [vmem:[%s2633_s9 + $0x10] sm:$0xff] }
 0x462   :  { %1472 = vmatpush3.msra.mxu0 %v1112_v49  ;;  %1507 = vmatpush3.msra.mxu1 %v1144_v50  ;;  %v1134_v48 = vld [vmem:[%s2633_s9 + $0x110] sm:$0xff]  ;;  %v1117_v49 = vld [vmem:[%s2633_s9 + $0x88] sm:$0xff] }
 0x463   :  { %1473 = vmatprep.subr.mxu0 %v1127_v51  ;;  %1508 = vmatprep.subr.mxu1 %v1159_v52  ;;  %v1149_v50 = vld [vmem:[%s2633_s9 + $0x188] sm:$0xff] }
 0x464   :  { %1474 = vmatpush3.msra.mxu0 %v1111_v53  ;;  %1509 = vmatpush3.msra.mxu1 %v1143_v54  ;;  %v1101_v51 = vld [vmem:[%s2633_s9 + $0x8] sm:$0xff]  ;;  %v1116_v53 = vld [vmem:[%s2633_s9 + $0x80] sm:$0xff] }
 0x465   :  { %1475 = vmatprep.subr.mxu0 %v1126_v55  ;;  %1510 = vmatprep.subr.mxu1 %v1158_v56  ;;  %v1133_v52 = vld [vmem:[%s2633_s9 + $0x108] sm:$0xff]  ;;  %v1148_v54 = vld [vmem:[%s2633_s9 + $0x180] sm:$0xff] }
 0x466   :  { %1476 = vmatpush3.msra.mxu0 %v1110_v57  ;;  %1511 = vmatpush3.msra.mxu1 %v1142_v58  ;;  %v1100_v55 = vld [vmem:[%s2633_s9] sm:$0xff] }
 0x467   :  { %1477 = vmatprep.subr.mxu0 %v1125_v63  ;;  %1512 = vmatprep.subr.mxu1 %v1157_v5  ;;  %v1132_v56 = vld [vmem:[%s2633_s9 + $0x100] sm:$0xff] }
 0x468   :  { %1478 = vmatpush3.msra.mxu0 %v1109_v7  ;;  %1513 = vmatpush3.msra.mxu1 %v1141_v8 }
 0x469   :  { %1479 = vmatprep.subr.mxu0 %v1124_v9  ;;  %1514 = vmatprep.subr.mxu1 %v1156_v10 }
 0x46a   :  { %1480 = vmatpush3.msra.mxu0 %v1108_v11  ;;  %1515 = vmatpush3.msra.mxu1 %v1140_v59 }
 0x46b   :  { %1481 = vmatprep.subr.mxu0 %v1123_v14  ;;  %1516 = vmatprep.subr.mxu1 %v1155_v15 }
 0x519   :  { %v1421_v16 = vpop.f32.mrf.mxu0  ;;  %v1459_v2 = vpop.f32.mrf.mxu1 }
 0x51b   :  { %v1422_v3 = vpop.f32.mrf.mxu0  ;;  %v1460_v0 = vpop.f32.mrf.mxu1 }
 0x51c   :  { %v1423_v1 = vadd.f32 %v1422_v3, %v1421_v16  ;;  %v1461_v17 = vadd.f32 %v1460_v0, %v1459_v2  ;;  %v1107_v16 = vld [vmem:[%s2633_s9 + $0x38] sm:$0xff]  ;;  %v1122_v0 = vld [vmem:[%s2633_s9 + $0xb0] sm:$0xff] }
 0x51d   :  { %v1424_v18 = vpop.f32.mrf.mxu0  ;;  %v1462_v19 = vpop.f32.mrf.mxu1  ;;  %v1139_v2 = vld [vmem:[%s2633_s9 + $0x138] sm:$0xff]  ;;  %1482 = vmatpush3.msra.mxu0 %v1107_v16 }
 0x51e   :  { %v1005_v20 = vadd.f32 %v1461_v17, %v1423_v1  ;;  %1517 = vmatpush3.msra.mxu1 %v1139_v2  ;;  %v1154_v1 = vld [vmem:[%s2633_s9 + $0x1b0] sm:$0xff]  ;;  %1483 = vmatprep.subr.mxu0 %v1122_v0 }
 0x51f   :  { %v1425_v21 = vpop.f32.mrf.mxu0  ;;  %v1463_v22 = vpop.f32.mrf.mxu1  ;;  %1518 = vmatprep.subr.mxu1 %v1154_v1 }
 0x520   :  { %v1013_v23 = vmul.f32 0.0034722222, %v1005_v20  ;;  %v1426_v24 = vadd.f32 %v1425_v21, %v1424_v18  ;;  %v1464_v25 = vadd.f32 %v1463_v22, %v1462_v19  ;;  %v1138_v20 = vld [vmem:[%s2633_s9 + $0x130] sm:$0xff] }
 0x521   :  { %1519 = vmatpush3.msra.mxu1 %v1138_v20 }
 0x522   :  { %v1010_v26 = vadd.f32 %v1464_v25, %v1426_v24  ;;  %1023 = vperm.xlu0 %1545, %v1013_v23   ;;  %v1015_v28 = vmul.f32 %v1013_v23, %v1013_v23  ;;  %v1105_v25 = vld [vmem:[%s2633_s9 + $0x28] sm:$0xff] }
 0x524   :  { %v1014_v29 = vmul.f32 0.0034722222, %v1010_v26  ;;  %v1137_v26 = vld [vmem:[%s2633_s9 + $0x128] sm:$0xff] }
 0x526   :  { %v1016_v30 = vsub.f32 %v1014_v29, %v1015_v28  ;;  %1041 = vperm.xlu0 %1545, %v553_v27   ;;  %v1120_v28 = vld [vmem:[%s2633_s9 + $0xa0] sm:$0xff] }
 0x527   :  { %v1152_v29 = vld [vmem:[%s2633_s9 + $0x1a0] sm:$0xff] }
 0x528   :  { %v1017_v31 = vmax.f32 %v1016_v30, 0.0  ;;  %v1104_v30 = vld [vmem:[%s2633_s9 + $0x20] sm:$0xff] }
 0x52a   :  { %v1018_v32 = vadd.f32 1e-05, %v1017_v31 }
 0x52c   :  { %1579 = vrsqrt.f32 %v1018_v32 }
 0x539   :  { %v1580_v34 = vpop.eup %1579 }
 0x53a   :  { %v1020_v35 = vmul.f32 %v1580_v34, %v552_v33 }
 0x53c   :  { %1032 = vperm.xlu1 %1546, %v1020_v35   ;;  %v1136_v35 = vld [vmem:[%s2633_s9 + $0x120] sm:$0xff] }
 0x59d   :  { %v1024_v61 = vpop.permute.xlu0 %1023 }
 0x59e   :  { %v1026_v3 = vsub.f32 %v2352_v12, %v1024_v61  ;;  %v1027_v17 = vsub.f32 %v2356_v60, %v1024_v61  ;;  %v1028_v18 = vsub.f32 %v2354_v13, %v1024_v61  ;;  %v1029_v19 = vsub.f32 %v2358_v62, %v1024_v61  ;;  %v1106_v12 = vld [vmem:[%s2633_s9 + $0x30] sm:$0xff]  ;;  %v1121_v60 = vld [vmem:[%s2633_s9 + $0xa8] sm:$0xff] }
 0x59f   :  { %1484 = vmatpush3.msra.mxu0 %v1106_v12  ;;  %v1153_v13 = vld [vmem:[%s2633_s9 + $0x1a8] sm:$0xff] }
 0x5a0   :  { %1485 = vmatprep.subr.mxu0 %v1121_v60  ;;  %1520 = vmatprep.subr.mxu1 %v1153_v13 }
 0x5a1   :  { %v1042_v27 = vpop.permute.xlu0 %1041  ;;  %1486 = vmatpush3.msra.mxu0 %v1105_v25  ;;  %1521 = vmatpush3.msra.mxu1 %v1137_v26 }
 0x5a2   :  { %1487 = vmatprep.subr.mxu0 %v1120_v28  ;;  %1522 = vmatprep.subr.mxu1 %v1152_v29 }
 0x5a3   :  { %1488 = vmatpush3.msra.mxu0 %v1104_v30  ;;  %1523 = vmatpush3.msra.mxu1 %v1136_v35 }
 0x5a4   :  { %1489 = vmatprep.subr.mxu0 %v1119_v4  ;;  %1524 = vmatprep.subr.mxu1 %v1151_v36 }
 0x5a5   :  { %1490 = vmatpush3.msra.mxu0 %v1103_v41  ;;  %1525 = vmatpush3.msra.mxu1 %v1135_v42 }
 0x5a6   :  { %1491 = vmatprep.subr.mxu0 %v1118_v43  ;;  %1526 = vmatprep.subr.mxu1 %v1150_v46 }
 0x5a7   :  { %1492 = vmatpush3.msra.mxu0 %v1102_v47  ;;  %1527 = vmatpush3.msra.mxu1 %v1134_v48 }
 0x5a8   :  { %1493 = vmatprep.subr.mxu0 %v1117_v49  ;;  %1528 = vmatprep.subr.mxu1 %v1149_v50 }
 0x5a9   :  { %1494 = vmatpush3.msra.mxu0 %v1101_v51  ;;  %1529 = vmatpush3.msra.mxu1 %v1133_v52 }
 0x5aa   :  { %1495 = vmatprep.subr.mxu0 %v1116_v53  ;;  %1530 = vmatprep.subr.mxu1 %v1148_v54 }
 0x5ab   :  { %1496 = vmatpush3.msra.mxu0 %v1100_v55  ;;  %1531 = vmatpush3.msra.mxu1 %v1132_v56 }
 0x5b7   :  { %v1033_v21 = vpop.permute.xlu1 %1032 }
 0x5b8   :  { %v1035_v62 = vmul.f32 %v1033_v21, %v1026_v3  ;;  %v1036_v22 = vmul.f32 %v1033_v21, %v1027_v17  ;;  %v1037_v23 = vmul.f32 %v1033_v21, %v1028_v18  ;;  %v1038_v24 = vmul.f32 %v1033_v21, %v1029_v19 }
 0x5ba   :  { %v2523_v31 = vadd.f32 %v1042_v27, %v1035_v62  ;;  %v2525_v32 = vadd.f32 %v1042_v27, %v1036_v22  ;;  %v2527_v33 = vadd.f32 %v1042_v27, %v1037_v23  ;;  %v2529_v34 = vadd.f32 %v1042_v27, %v1038_v24 }
 0x5bc   :  { %v1048_v37 = vmax.f32 %v2523_v31, 0.0  ;;  %v1049_v38 = vmax.f32 %v2525_v32, 0.0  ;;  %v1050_v39 = vmax.f32 %v2527_v33, 0.0  ;;  %v1051_v40 = vmax.f32 %v2529_v34, 0.0 }
 0x5be   :  { %v1552_v44 = vpack.i.bf16 %v1051_v40, %v1050_v39  ;;  %v1547_v45 = vpack.i.bf16 %v1049_v38, %v1048_v37 }
 0x5c0   :  { %1553 = vrot.lane.b32.xlu0 %v1552_v44, %s1589_s27  ;;  %1548 = vrot.lane.b32.xlu1 %v1547_v45, %s1589_s27 }
 0x5c4   :  { %1563 = vrot.lane.b32.xlu0 %v1552_v44, %s1586_s25  ;;  %1558 = vrot.lane.b32.xlu1 %v1547_v45, %s1586_s25 }
 0x5c8   :  { %1573 = vrot.lane.b32.xlu0 %v1552_v44, %s1585_s24  ;;  %1568 = vrot.lane.b32.xlu1 %v1547_v45, %s1585_s24 }
 0x632   :  { %v1554_v57 = vpop.permute.xlu0 %1553  ;;  %v1549_v58 = vpop.permute.xlu1 %1548 }
 0x633   :  { %v1556_v63 = vunpack.i.h.bf16 %v1554_v57  ;;  %v1555_v5 = vunpack.i.l.bf16 %v1554_v57  ;;  %v1551_v7 = vunpack.i.h.bf16 %v1549_v58  ;;  %v1550_v8 = vunpack.i.l.bf16 %v1549_v58 }
 0x635   :  { %v1060_v11 = vsel %vm116_vm7, %v1555_v5, %v1556_v63  ;;  %v1061_v59 = vsel %vm116_vm7, %v1551_v7, %v1555_v5  ;;  %v1062_v61 = vsel %vm116_vm7, %v1550_v8, %v1551_v7  ;;  %v1063_v14 = vsel %vm116_vm7, %v1556_v63, %v1550_v8 }
 0x636   :  { %v1564_v9 = vpop.permute.xlu0 %1563  ;;  %v1559_v10 = vpop.permute.xlu1 %1558  ;;  %v1066_v0 = vmax.f32 %v1050_v39, %v1060_v11  ;;  %v1064_v1 = vmax.f32 %v1048_v37, %v1062_v61  ;;  %v1065_v19 = vmax.f32 %v1049_v38, %v1061_v59  ;;  %v1067_v12 = vmax.f32 %v1051_v40, %v1063_v14 }
 0x637   :  { %v1566_v15 = vunpack.i.h.bf16 %v1564_v9  ;;  %v1565_v16 = vunpack.i.l.bf16 %v1564_v9  ;;  %v1561_v2 = vunpack.i.h.bf16 %v1559_v10  ;;  %v1560_v3 = vunpack.i.l.bf16 %v1559_v10 }
 0x639   :  { %v1076_v62 = vsel %vm142_vm5, %v1565_v16, %v1566_v15  ;;  %v1077_v22 = vsel %vm142_vm5, %v1561_v2, %v1565_v16  ;;  %v1078_v23 = vsel %vm142_vm5, %v1560_v3, %v1561_v2  ;;  %v1079_v24 = vsel %vm142_vm5, %v1566_v15, %v1560_v3 }
 0x63a   :  { %v1574_v17 = vpop.permute.xlu0 %1573  ;;  %v1569_v18 = vpop.permute.xlu1 %1568 }
 0x63b   :  { %v1576_v20 = vunpack.i.h.bf16 %v1574_v17  ;;  %v1575_v21 = vunpack.i.l.bf16 %v1574_v17  ;;  %v1571_v60 = vunpack.i.h.bf16 %v1569_v18  ;;  %v1570_v13 = vunpack.i.l.bf16 %v1569_v18 }
 0x63d   :  { %v1088_v25 = vsel %vm155_vm4, %v1575_v21, %v1576_v20  ;;  %v1089_v26 = vsel %vm155_vm4, %v1571_v60, %v1575_v21  ;;  %v1090_v27 = vsel %vm155_vm4, %v1570_v13, %v1571_v60  ;;  %v1091_v28 = vsel %vm155_vm4, %v1576_v20, %v1570_v13 }
 0x63e   :  { %v1094_v29 = vmax.f32 %v1076_v62, %v1088_v25  ;;  %v1092_v30 = vmax.f32 %v1078_v23, %v1090_v27  ;;  %v1093_v31 = vmax.f32 %v1077_v22, %v1089_v26  ;;  %v1095_v32 = vmax.f32 %v1079_v24, %v1091_v28 }
 0x640   :  { %v1098_v33 = vmax.f32 %v1066_v0, %v1094_v29  ;;  %v1096_v34 = vmax.f32 %v1064_v1, %v1092_v30  ;;  %v1097_v35 = vmax.f32 %v1065_v19, %v1093_v31  ;;  %v1099_v4 = vmax.f32 %v1067_v12, %v1095_v32 }
 0x642   :  { %1228 = vmatprep.mubr.f32.mxu0 %v1097_v35  ;;  %1298 = vmatprep.mubr.f32.mxu1 %v1099_v4 }
 0x643   :  { %1229 = vmatmul.mubr.f32.vlgmr.msra.gmra.mxu0 %v1096_v34  ;;  %1299 = vmatmul.mubr.f32.vlgmr.msra.gmra.mxu1 %v1098_v33 }
 0x703   :  { %v1497_v36 = vpop.f32.mrf.mxu0  ;;  %v1532_v37 = vpop.f32.mrf.mxu1 }
 0x705   :  { %v1498_v38 = vpop.f32.mrf.mxu0  ;;  %v1533_v39 = vpop.f32.mrf.mxu1 }
 0x706   :  { %v1499_v40 = vadd.f32 %v1498_v38, %v1497_v36  ;;  %v1534_v41 = vadd.f32 %v1533_v39, %v1532_v37 }
 0x708   :  { %v1301_v6 = vadd.f32 %v1534_v41, %v1499_v40 }
 0x70a   :  { %1304 = vst.msk [vmem:[%s2634_s10] sm:$0xff] %vm212_vm8, %v1301_v6 }

</bundles_post_ra>
